<compile_context>
chip_gen: v7x
topology: tpu7x:2x2x1
jax: 0.10.0
libtpu: 0.0.40
codegen_flags: <defaults>
</compile_context>

<pallas_src>
import jax
import jax.numpy as jnp
from jax.experimental import pallas as pl
from jax.experimental.pallas import tpu as pltpu

EMB_VOCAB = 1000
E = 16     # embedding dim / LSTM input size
H = 128    # LSTM hidden size


def lstm_kernel(x_ref, wih_ref, whh_ref, b_ref, wout_ref, bout_ref,
                out_ref, gx_ref):
    """Whole forward (minus the embedding gather) in a single invocation.

    x_ref    : (S*Bp, E)   embedded inputs, row t*Bp + b = token (t, b)
    wih_ref  : (E, 4H)     W_ih^T
    whh_ref  : (H, 4H)     W_hh^T
    b_ref    : (1, 4H)     b_ih + b_hh
    wout_ref : (1, H)      W_out row
    bout_ref : (1, 1)      b_out
    out_ref  : (Bp, S)     softmax-over-seq output, sequence axis on lanes
    gx_ref   : (S*Bp, 4H)  VMEM scratch holding the hoisted input projection
    """
    Bp, S = out_ref.shape

    # All timesteps' input-to-hidden projections in ONE matmul (prologue).
    gx_ref[...] = (jnp.dot(x_ref[...], wih_ref[...],
                           preferred_element_type=jnp.float32)
                   + b_ref[...])

    w_row = wout_ref[...]                                   # (1, H)
    pos = jax.lax.broadcasted_iota(jnp.int32, (1, S), 1)    # lane positions

    h = jnp.zeros((Bp, H), jnp.float32)
    c = jnp.zeros((Bp, H), jnp.float32)
    z = jnp.zeros((Bp, S), jnp.float32)                     # logits, seq on lanes

    for t in range(S):                                      # static, fully unrolled
        gates = (gx_ref[t * Bp:(t + 1) * Bp, :]
                 + jnp.dot(h, whh_ref[...],
                           preferred_element_type=jnp.float32))   # (Bp, 4H)
        # PyTorch LSTM gate order: i, f, g, o
        i_g = jax.nn.sigmoid(gates[:, 0 * H:1 * H])
        f_g = jax.nn.sigmoid(gates[:, 1 * H:2 * H])
        g_g = jnp.tanh(gates[:, 2 * H:3 * H])
        o_g = jax.nn.sigmoid(gates[:, 3 * H:4 * H])
        c = f_g * c + i_g * g_g
        h = o_g * jnp.tanh(c)
        # Linear(128 -> 1) head: VPU multiply + XLU lane reduce (no N=1 MXU push).
        logit = (jnp.sum(h * w_row, axis=-1, keepdims=True)
                 + bout_ref[...])                           # (Bp, 1)
        # Deposit into column t of the lane-dense logit matrix.
        z = z + logit * (pos == t).astype(jnp.float32)

    # Softmax over the sequence axis (lanes) — legacy torch.nn.Softmax() dim=0.
    m = jnp.max(z, axis=-1, keepdims=True)
    e = jnp.exp(z - m)
    out_ref[...] = e / jnp.sum(e, axis=-1, keepdims=True)


def lstm_model_forward(x_idx, params):
    """x_idx: (S, B) int32 token ids -> (S, B, 1) float32 softmax over seq."""
    emb, w_ih, w_hh, b_ih, b_hh, w_out, b_out = params
    S, B = x_idx.shape
    Bp = ((B + 7) // 8) * 8                    # pad batch to f32 sublane granule

    # Embedding gather is glue (tiny, data-dependent) — done in XLA.
    x_emb = jnp.take(emb, x_idx, axis=0).astype(jnp.float32)      # (S, B, E)
    x_emb = jnp.pad(x_emb, ((0, 0), (0, Bp - B), (0, 0)))          # (S, Bp, E)
    x_flat = x_emb.reshape(S * Bp, E)

    wih_T = w_ih.T                             # (E, 4H)
    whh_T = w_hh.T                             # (H, 4H)
    bias = (b_ih + b_hh).reshape(1, 4 * H)
    w_out_row = w_out.reshape(1, H)
    bout = b_out.reshape(1, 1)

    out_pad = pl.pallas_call(
        lstm_kernel,
        out_shape=jax.ShapeDtypeStruct((Bp, S), jnp.float32),
        scratch_shapes=[pltpu.VMEM((S * Bp, 4 * H), jnp.float32)],
    )(x_flat, wih_T, whh_T, bias, w_out_row, bout)

    # (Bp, S) -> drop batch padding, transpose to (S, B), add trailing dim.
    return out_pad[:B, :].T[..., None]


def reference_forward(x_idx, params):
    """Pure-JAX reference mirroring PyTorch semantics."""
    emb, w_ih, w_hh, b_ih, b_hh, w_out, b_out = params
    x = jnp.take(emb, x_idx, axis=0)           # (S, B, E)
    S, B, _ = x.shape
    h = jnp.zeros((B, H), jnp.float32)
    c = jnp.zeros((B, H), jnp.float32)
    outs = []
    for t in range(S):
        gates = x[t] @ w_ih.T + b_ih + h @ w_hh.T + b_hh
        i = jax.nn.sigmoid(gates[:, 0:H])
        f = jax.nn.sigmoid(gates[:, H:2 * H])
        g = jnp.tanh(gates[:, 2 * H:3 * H])
        o = jax.nn.sigmoid(gates[:, 3 * H:4 * H])
        c = f * c + i * g
        h = o * jnp.tanh(c)
        outs.append(h @ w_out.T + b_out)
    z = jnp.stack(outs, axis=0)                # (S, B, 1)
    return jax.nn.softmax(z, axis=0)           # softmax over seq dim (dim=0)


def init_params(key):
    k_emb, k_wih, k_whh, k_bih, k_bhh, k_wo, k_bo = jax.random.split(key, 7)
    bound = 1.0 / (H ** 0.5)
    emb = jax.random.normal(k_emb, (EMB_VOCAB, E), jnp.float32)
    w_ih = jax.random.uniform(k_wih, (4 * H, E), jnp.float32, -bound, bound)
    w_hh = jax.random.uniform(k_whh, (4 * H, H), jnp.float32, -bound, bound)
    b_ih = jax.random.uniform(k_bih, (4 * H,), jnp.float32, -bound, bound)
    b_hh = jax.random.uniform(k_bhh, (4 * H,), jnp.float32, -bound, bound)
    w_out = jax.random.uniform(k_wo, (1, H), jnp.float32, -bound, bound)
    b_out = jax.random.uniform(k_bo, (1,), jnp.float32, -bound, bound)
    return emb, w_ih, w_hh, b_ih, b_hh, w_out, b_out


if __name__ == "__main__":
    key = jax.random.PRNGKey(0)
    k_params, k_x = jax.random.split(key)
    params = init_params(k_params)

    S, B = 8, 4                                # seq=8, batch=4
    x_idx = jax.random.randint(k_x, (S, B), 0, EMB_VOCAB, dtype=jnp.int32)

    out = lstm_model_forward(x_idx, params)
    out = jax.block_until_ready(out)

    ref = reference_forward(x_idx, params)
    assert out.shape == (S, B, 1)
    assert jnp.allclose(out, ref, atol=1e-4, rtol=1e-4), "mismatch vs reference"

    print("KERNEL_OK")
</pallas_src>

<mosaic_0001>
module attributes {stable_mosaic.version = 11 : i64} {
  func.func @lstm_kernel(%arg0: memref<64x16xf32, #tpu.memory_space<vmem>>, %arg1: memref<16x512xf32, #tpu.memory_space<vmem>>, %arg2: memref<128x512xf32, #tpu.memory_space<vmem>>, %arg3: memref<1x512xf32, #tpu.memory_space<vmem>>, %arg4: memref<1x128xf32, #tpu.memory_space<vmem>>, %arg5: memref<1x1xf32, #tpu.memory_space<vmem>>, %arg6: memref<8x8xf32, #tpu.memory_space<vmem>>, %arg7: memref<64x512xf32, #tpu.memory_space<vmem>>) attributes {dimension_semantics = [], scalar_prefetch = 0 : i64, scratch_operands = 1 : i64, tpu.core_type = #tpu.core_type<tc>} {
    %c0 = arith.constant 0 : index
    %c0_0 = arith.constant 0 : index
    %0 = vector.load %arg0[%c0, %c0_0] : memref<64x16xf32, #tpu.memory_space<vmem>>, vector<64x16xf32>
    %c0_1 = arith.constant 0 : index
    %c0_2 = arith.constant 0 : index
    %1 = vector.load %arg1[%c0_1, %c0_2] : memref<16x512xf32, #tpu.memory_space<vmem>>, vector<16x512xf32>
    %cst = arith.constant dense<0.000000e+00> : vector<64x512xf32>
    %2 = tpu.matmul %0, %1, %cst {dimension_numbers = #tpu.dot_dimension_numbers<[1], [0], [0], [1], [0, 0, 1, 1], [], []>} : vector<64x16xf32>, vector<16x512xf32>, vector<64x512xf32> -> vector<64x512xf32>
    %c0_3 = arith.constant 0 : index
    %c0_4 = arith.constant 0 : index
    %3 = vector.load %arg3[%c0_3, %c0_4] : memref<1x512xf32, #tpu.memory_space<vmem>>, vector<1x512xf32>
    %4 = vector.broadcast %3 : vector<1x512xf32> to vector<64x512xf32>
    %5 = arith.addf %2, %4 : vector<64x512xf32>
    %c0_5 = arith.constant 0 : index
    %c0_6 = arith.constant 0 : index
    %6 = vector.load %arg7[%c0_5, %c0_6] : memref<64x512xf32, #tpu.memory_space<vmem>>, vector<64x512xf32>
    tpu.vector_store %arg7[%c0_5, %c0_6], %5 {strides = array<i32>} : memref<64x512xf32, #tpu.memory_space<vmem>>, vector<64x512xf32>,
    %c0_7 = arith.constant 0 : index
    %c0_8 = arith.constant 0 : index
    %7 = vector.load %arg4[%c0_7, %c0_8] : memref<1x128xf32, #tpu.memory_space<vmem>>, vector<1x128xf32>
    %8 = tpu.iota {dimensions = array<i32: 1>} : vector<1x8xi32>
    %cst_9 = arith.constant 0.000000e+00 : f32
    %9 = vector.broadcast %cst_9 : f32 to vector<8x128xf32>
    %cst_10 = arith.constant 0.000000e+00 : f32
    %10 = vector.broadcast %cst_10 : f32 to vector<8x128xf32>
    %cst_11 = arith.constant 0.000000e+00 : f32
    %11 = vector.broadcast %cst_11 : f32 to vector<8x8xf32>
    %c0_12 = arith.constant 0 : index
    %c0_13 = arith.constant 0 : index
    %12 = vector.load %arg7[%c0_12, %c0_13] : memref<64x512xf32, #tpu.memory_space<vmem>>, vector<8x512xf32>
    %c0_14 = arith.constant 0 : index
    %c0_15 = arith.constant 0 : index
    %13 = vector.load %arg2[%c0_14, %c0_15] : memref<128x512xf32, #tpu.memory_space<vmem>>, vector<128x512xf32>
    %cst_16 = arith.constant dense<0.000000e+00> : vector<8x512xf32>
    %14 = tpu.matmul %9, %13, %cst_16 {dimension_numbers = #tpu.dot_dimension_numbers<[1], [0], [0], [1], [0, 0, 1, 1], [], []>} : vector<8x128xf32>, vector<128x512xf32>, vector<8x512xf32> -> vector<8x512xf32>
    %15 = arith.addf %12, %14 : vector<8x512xf32>
    %16 = vector.extract_strided_slice %15 {offsets = [0, 0], sizes = [8, 128], strides = [1, 1]} : vector<8x512xf32> to vector<8x128xf32>
    %17 = arith.negf %16 : vector<8x128xf32>
    %18 = math.exp %17 : vector<8x128xf32>
    %cst_17 = arith.constant 1.000000e+00 : f32
    %19 = vector.broadcast %cst_17 : f32 to vector<8x128xf32>
    %20 = arith.addf %19, %18 : vector<8x128xf32>
    %21 = arith.divf %19, %20 : vector<8x128xf32>
    %22 = vector.extract_strided_slice %15 {offsets = [0, 128], sizes = [8, 128], strides = [1, 1]} : vector<8x512xf32> to vector<8x128xf32>
    %23 = arith.negf %22 : vector<8x128xf32>
    %24 = math.exp %23 : vector<8x128xf32>
    %cst_18 = arith.constant 1.000000e+00 : f32
    %25 = vector.broadcast %cst_18 : f32 to vector<8x128xf32>
    %26 = arith.addf %25, %24 : vector<8x128xf32>
    %27 = arith.divf %25, %26 : vector<8x128xf32>
    %28 = vector.extract_strided_slice %15 {offsets = [0, 256], sizes = [8, 128], strides = [1, 1]} : vector<8x512xf32> to vector<8x128xf32>
    %29 = math.tanh %28 : vector<8x128xf32>
    %30 = vector.extract_strided_slice %15 {offsets = [0, 384], sizes = [8, 128], strides = [1, 1]} : vector<8x512xf32> to vector<8x128xf32>
    %31 = arith.negf %30 : vector<8x128xf32>
    %32 = math.exp %31 : vector<8x128xf32>
    %cst_19 = arith.constant 1.000000e+00 : f32
    %33 = vector.broadcast %cst_19 : f32 to vector<8x128xf32>
    %34 = arith.addf %33, %32 : vector<8x128xf32>
    %35 = arith.divf %33, %34 : vector<8x128xf32>
    %36 = arith.mulf %27, %10 : vector<8x128xf32>
    %37 = arith.mulf %21, %29 : vector<8x128xf32>
    %38 = arith.addf %36, %37 : vector<8x128xf32>
    %39 = math.tanh %38 : vector<8x128xf32>
    %40 = arith.mulf %35, %39 : vector<8x128xf32>
    %41 = vector.broadcast %7 : vector<1x128xf32> to vector<8x128xf32>
    %42 = arith.mulf %40, %41 : vector<8x128xf32>
    %cst_20 = arith.constant dense<0.000000e+00> : vector<8xf32>
    %43 = vector.multi_reduction <add>, %42, %cst_20 [1] : vector<8x128xf32> to vector<8xf32>
    %44 = vector.shape_cast %43 : vector<8xf32> to vector<8x1xf32>
    %c0_21 = arith.constant 0 : index
    %c0_22 = arith.constant 0 : index
    %45 = vector.load %arg5[%c0_21, %c0_22] : memref<1x1xf32, #tpu.memory_space<vmem>>, vector<1x1xf32>
    %46 = vector.broadcast %45 : vector<1x1xf32> to vector<8x1xf32>
    %47 = arith.addf %44, %46 : vector<8x1xf32>
    %c0_i32 = arith.constant 0 : i32
    %48 = vector.broadcast %c0_i32 : i32 to vector<1x8xi32>
    %49 = arith.cmpi eq, %8, %48 : vector<1x8xi32>
    %50 = arith.extui %49 : vector<1x8xi1> to vector<1x8xi32>
    %51 = arith.sitofp %50 : vector<1x8xi32> to vector<1x8xf32>
    %52 = vector.broadcast %47 : vector<8x1xf32> to vector<8x8xf32>
    %53 = vector.broadcast %51 : vector<1x8xf32> to vector<8x8xf32>
    %54 = arith.mulf %52, %53 : vector<8x8xf32>
    %55 = arith.addf %11, %54 : vector<8x8xf32>
    %c8 = arith.constant 8 : index
    %c0_23 = arith.constant 0 : index
    %56 = vector.load %arg7[%c8, %c0_23] : memref<64x512xf32, #tpu.memory_space<vmem>>, vector<8x512xf32>
    %c0_24 = arith.constant 0 : index
    %c0_25 = arith.constant 0 : index
    %57 = vector.load %arg2[%c0_24, %c0_25] : memref<128x512xf32, #tpu.memory_space<vmem>>, vector<128x512xf32>
    %cst_26 = arith.constant dense<0.000000e+00> : vector<8x512xf32>
    %58 = tpu.matmul %40, %57, %cst_26 {dimension_numbers = #tpu.dot_dimension_numbers<[1], [0], [0], [1], [0, 0, 1, 1], [], []>} : vector<8x128xf32>, vector<128x512xf32>, vector<8x512xf32> -> vector<8x512xf32>
    %59 = arith.addf %56, %58 : vector<8x512xf32>
    %60 = vector.extract_strided_slice %59 {offsets = [0, 0], sizes = [8, 128], strides = [1, 1]} : vector<8x512xf32> to vector<8x128xf32>
    %61 = arith.negf %60 : vector<8x128xf32>
    %62 = math.exp %61 : vector<8x128xf32>
    %cst_27 = arith.constant 1.000000e+00 : f32
    %63 = vector.broadcast %cst_27 : f32 to vector<8x128xf32>
    %64 = arith.addf %63, %62 : vector<8x128xf32>
    %65 = arith.divf %63, %64 : vector<8x128xf32>
    %66 = vector.extract_strided_slice %59 {offsets = [0, 128], sizes = [8, 128], strides = [1, 1]} : vector<8x512xf32> to vector<8x128xf32>
    %67 = arith.negf %66 : vector<8x128xf32>
    %68 = math.exp %67 : vector<8x128xf32>
    %cst_28 = arith.constant 1.000000e+00 : f32
    %69 = vector.broadcast %cst_28 : f32 to vector<8x128xf32>
    %70 = arith.addf %69, %68 : vector<8x128xf32>
    %71 = arith.divf %69, %70 : vector<8x128xf32>
    %72 = vector.extract_strided_slice %59 {offsets = [0, 256], sizes = [8, 128], strides = [1, 1]} : vector<8x512xf32> to vector<8x128xf32>
    %73 = math.tanh %72 : vector<8x128xf32>
    %74 = vector.extract_strided_slice %59 {offsets = [0, 384], sizes = [8, 128], strides = [1, 1]} : vector<8x512xf32> to vector<8x128xf32>
    %75 = arith.negf %74 : vector<8x128xf32>
    %76 = math.exp %75 : vector<8x128xf32>
    %cst_29 = arith.constant 1.000000e+00 : f32
    %77 = vector.broadcast %cst_29 : f32 to vector<8x128xf32>
    %78 = arith.addf %77, %76 : vector<8x128xf32>
    %79 = arith.divf %77, %78 : vector<8x128xf32>
    %80 = arith.mulf %71, %38 : vector<8x128xf32>
    %81 = arith.mulf %65, %73 : vector<8x128xf32>
    %82 = arith.addf %80, %81 : vector<8x128xf32>
    %83 = math.tanh %82 : vector<8x128xf32>
    %84 = arith.mulf %79, %83 : vector<8x128xf32>
    %85 = vector.broadcast %7 : vector<1x128xf32> to vector<8x128xf32>
    %86 = arith.mulf %84, %85 : vector<8x128xf32>
    %cst_30 = arith.constant dense<0.000000e+00> : vector<8xf32>
    %87 = vector.multi_reduction <add>, %86, %cst_30 [1] : vector<8x128xf32> to vector<8xf32>
    %88 = vector.shape_cast %87 : vector<8xf32> to vector<8x1xf32>
    %c0_31 = arith.constant 0 : index
    %c0_32 = arith.constant 0 : index
    %89 = vector.load %arg5[%c0_31, %c0_32] : memref<1x1xf32, #tpu.memory_space<vmem>>, vector<1x1xf32>
    %90 = vector.broadcast %89 : vector<1x1xf32> to vector<8x1xf32>
    %91 = arith.addf %88, %90 : vector<8x1xf32>
    %c1_i32 = arith.constant 1 : i32
    %92 = vector.broadcast %c1_i32 : i32 to vector<1x8xi32>
    %93 = arith.cmpi eq, %8, %92 : vector<1x8xi32>
    %94 = arith.extui %93 : vector<1x8xi1> to vector<1x8xi32>
    %95 = arith.sitofp %94 : vector<1x8xi32> to vector<1x8xf32>
    %96 = vector.broadcast %91 : vector<8x1xf32> to vector<8x8xf32>
    %97 = vector.broadcast %95 : vector<1x8xf32> to vector<8x8xf32>
    %98 = arith.mulf %96, %97 : vector<8x8xf32>
    %99 = arith.addf %55, %98 : vector<8x8xf32>
    %c16 = arith.constant 16 : index
    %c0_33 = arith.constant 0 : index
    %100 = vector.load %arg7[%c16, %c0_33] : memref<64x512xf32, #tpu.memory_space<vmem>>, vector<8x512xf32>
    %c0_34 = arith.constant 0 : index
    %c0_35 = arith.constant 0 : index
    %101 = vector.load %arg2[%c0_34, %c0_35] : memref<128x512xf32, #tpu.memory_space<vmem>>, vector<128x512xf32>
    %cst_36 = arith.constant dense<0.000000e+00> : vector<8x512xf32>
    %102 = tpu.matmul %84, %101, %cst_36 {dimension_numbers = #tpu.dot_dimension_numbers<[1], [0], [0], [1], [0, 0, 1, 1], [], []>} : vector<8x128xf32>, vector<128x512xf32>, vector<8x512xf32> -> vector<8x512xf32>
    %103 = arith.addf %100, %102 : vector<8x512xf32>
    %104 = vector.extract_strided_slice %103 {offsets = [0, 0], sizes = [8, 128], strides = [1, 1]} : vector<8x512xf32> to vector<8x128xf32>
    %105 = arith.negf %104 : vector<8x128xf32>
    %106 = math.exp %105 : vector<8x128xf32>
    %cst_37 = arith.constant 1.000000e+00 : f32
    %107 = vector.broadcast %cst_37 : f32 to vector<8x128xf32>
    %108 = arith.addf %107, %106 : vector<8x128xf32>
    %109 = arith.divf %107, %108 : vector<8x128xf32>
    %110 = vector.extract_strided_slice %103 {offsets = [0, 128], sizes = [8, 128], strides = [1, 1]} : vector<8x512xf32> to vector<8x128xf32>
    %111 = arith.negf %110 : vector<8x128xf32>
    %112 = math.exp %111 : vector<8x128xf32>
    %cst_38 = arith.constant 1.000000e+00 : f32
    %113 = vector.broadcast %cst_38 : f32 to vector<8x128xf32>
    %114 = arith.addf %113, %112 : vector<8x128xf32>
    %115 = arith.divf %113, %114 : vector<8x128xf32>
    %116 = vector.extract_strided_slice %103 {offsets = [0, 256], sizes = [8, 128], strides = [1, 1]} : vector<8x512xf32> to vector<8x128xf32>
    %117 = math.tanh %116 : vector<8x128xf32>
    %118 = vector.extract_strided_slice %103 {offsets = [0, 384], sizes = [8, 128], strides = [1, 1]} : vector<8x512xf32> to vector<8x128xf32>
    %119 = arith.negf %118 : vector<8x128xf32>
    %120 = math.exp %119 : vector<8x128xf32>
    %cst_39 = arith.constant 1.000000e+00 : f32
    %121 = vector.broadcast %cst_39 : f32 to vector<8x128xf32>
    %122 = arith.addf %121, %120 : vector<8x128xf32>
    %123 = arith.divf %121, %122 : vector<8x128xf32>
    %124 = arith.mulf %115, %82 : vector<8x128xf32>
    %125 = arith.mulf %109, %117 : vector<8x128xf32>
    %126 = arith.addf %124, %125 : vector<8x128xf32>
    %127 = math.tanh %126 : vector<8x128xf32>
    %128 = arith.mulf %123, %127 : vector<8x128xf32>
    %129 = vector.broadcast %7 : vector<1x128xf32> to vector<8x128xf32>
    %130 = arith.mulf %128, %129 : vector<8x128xf32>
    %cst_40 = arith.constant dense<0.000000e+00> : vector<8xf32>
    %131 = vector.multi_reduction <add>, %130, %cst_40 [1] : vector<8x128xf32> to vector<8xf32>
    %132 = vector.shape_cast %131 : vector<8xf32> to vector<8x1xf32>
    %c0_41 = arith.constant 0 : index
    %c0_42 = arith.constant 0 : index
    %133 = vector.load %arg5[%c0_41, %c0_42] : memref<1x1xf32, #tpu.memory_space<vmem>>, vector<1x1xf32>
    %134 = vector.broadcast %133 : vector<1x1xf32> to vector<8x1xf32>
    %135 = arith.addf %132, %134 : vector<8x1xf32>
    %c2_i32 = arith.constant 2 : i32
    %136 = vector.broadcast %c2_i32 : i32 to vector<1x8xi32>
    %137 = arith.cmpi eq, %8, %136 : vector<1x8xi32>
    %138 = arith.extui %137 : vector<1x8xi1> to vector<1x8xi32>
    %139 = arith.sitofp %138 : vector<1x8xi32> to vector<1x8xf32>
    %140 = vector.broadcast %135 : vector<8x1xf32> to vector<8x8xf32>
    %141 = vector.broadcast %139 : vector<1x8xf32> to vector<8x8xf32>
    %142 = arith.mulf %140, %141 : vector<8x8xf32>
    %143 = arith.addf %99, %142 : vector<8x8xf32>
    %c24 = arith.constant 24 : index
    %c0_43 = arith.constant 0 : index
    %144 = vector.load %arg7[%c24, %c0_43] : memref<64x512xf32, #tpu.memory_space<vmem>>, vector<8x512xf32>
    %c0_44 = arith.constant 0 : index
    %c0_45 = arith.constant 0 : index
    %145 = vector.load %arg2[%c0_44, %c0_45] : memref<128x512xf32, #tpu.memory_space<vmem>>, vector<128x512xf32>
    %cst_46 = arith.constant dense<0.000000e+00> : vector<8x512xf32>
    %146 = tpu.matmul %128, %145, %cst_46 {dimension_numbers = #tpu.dot_dimension_numbers<[1], [0], [0], [1], [0, 0, 1, 1], [], []>} : vector<8x128xf32>, vector<128x512xf32>, vector<8x512xf32> -> vector<8x512xf32>
    %147 = arith.addf %144, %146 : vector<8x512xf32>
    %148 = vector.extract_strided_slice %147 {offsets = [0, 0], sizes = [8, 128], strides = [1, 1]} : vector<8x512xf32> to vector<8x128xf32>
    %149 = arith.negf %148 : vector<8x128xf32>
    %150 = math.exp %149 : vector<8x128xf32>
    %cst_47 = arith.constant 1.000000e+00 : f32
    %151 = vector.broadcast %cst_47 : f32 to vector<8x128xf32>
    %152 = arith.addf %151, %150 : vector<8x128xf32>
    %153 = arith.divf %151, %152 : vector<8x128xf32>
    %154 = vector.extract_strided_slice %147 {offsets = [0, 128], sizes = [8, 128], strides = [1, 1]} : vector<8x512xf32> to vector<8x128xf32>
    %155 = arith.negf %154 : vector<8x128xf32>
    %156 = math.exp %155 : vector<8x128xf32>
    %cst_48 = arith.constant 1.000000e+00 : f32
    %157 = vector.broadcast %cst_48 : f32 to vector<8x128xf32>
    %158 = arith.addf %157, %156 : vector<8x128xf32>
    %159 = arith.divf %157, %158 : vector<8x128xf32>
    %160 = vector.extract_strided_slice %147 {offsets = [0, 256], sizes = [8, 128], strides = [1, 1]} : vector<8x512xf32> to vector<8x128xf32>
    %161 = math.tanh %160 : vector<8x128xf32>
    %162 = vector.extract_strided_slice %147 {offsets = [0, 384], sizes = [8, 128], strides = [1, 1]} : vector<8x512xf32> to vector<8x128xf32>
    %163 = arith.negf %162 : vector<8x128xf32>
    %164 = math.exp %163 : vector<8x128xf32>
    %cst_49 = arith.constant 1.000000e+00 : f32
    %165 = vector.broadcast %cst_49 : f32 to vector<8x128xf32>
    %166 = arith.addf %165, %164 : vector<8x128xf32>
    %167 = arith.divf %165, %166 : vector<8x128xf32>
    %168 = arith.mulf %159, %126 : vector<8x128xf32>
    %169 = arith.mulf %153, %161 : vector<8x128xf32>
    %170 = arith.addf %168, %169 : vector<8x128xf32>
    %171 = math.tanh %170 : vector<8x128xf32>
    %172 = arith.mulf %167, %171 : vector<8x128xf32>
    %173 = vector.broadcast %7 : vector<1x128xf32> to vector<8x128xf32>
    %174 = arith.mulf %172, %173 : vector<8x128xf32>
    %cst_50 = arith.constant dense<0.000000e+00> : vector<8xf32>
    %175 = vector.multi_reduction <add>, %174, %cst_50 [1] : vector<8x128xf32> to vector<8xf32>
    %176 = vector.shape_cast %175 : vector<8xf32> to vector<8x1xf32>
    %c0_51 = arith.constant 0 : index
    %c0_52 = arith.constant 0 : index
    %177 = vector.load %arg5[%c0_51, %c0_52] : memref<1x1xf32, #tpu.memory_space<vmem>>, vector<1x1xf32>
    %178 = vector.broadcast %177 : vector<1x1xf32> to vector<8x1xf32>
    %179 = arith.addf %176, %178 : vector<8x1xf32>
    %c3_i32 = arith.constant 3 : i32
    %180 = vector.broadcast %c3_i32 : i32 to vector<1x8xi32>
    %181 = arith.cmpi eq, %8, %180 : vector<1x8xi32>
    %182 = arith.extui %181 : vector<1x8xi1> to vector<1x8xi32>
    %183 = arith.sitofp %182 : vector<1x8xi32> to vector<1x8xf32>
    %184 = vector.broadcast %179 : vector<8x1xf32> to vector<8x8xf32>
    %185 = vector.broadcast %183 : vector<1x8xf32> to vector<8x8xf32>
    %186 = arith.mulf %184, %185 : vector<8x8xf32>
    %187 = arith.addf %143, %186 : vector<8x8xf32>
    %c32 = arith.constant 32 : index
    %c0_53 = arith.constant 0 : index
    %188 = vector.load %arg7[%c32, %c0_53] : memref<64x512xf32, #tpu.memory_space<vmem>>, vector<8x512xf32>
    %c0_54 = arith.constant 0 : index
    %c0_55 = arith.constant 0 : index
    %189 = vector.load %arg2[%c0_54, %c0_55] : memref<128x512xf32, #tpu.memory_space<vmem>>, vector<128x512xf32>
    %cst_56 = arith.constant dense<0.000000e+00> : vector<8x512xf32>
    %190 = tpu.matmul %172, %189, %cst_56 {dimension_numbers = #tpu.dot_dimension_numbers<[1], [0], [0], [1], [0, 0, 1, 1], [], []>} : vector<8x128xf32>, vector<128x512xf32>, vector<8x512xf32> -> vector<8x512xf32>
    %191 = arith.addf %188, %190 : vector<8x512xf32>
    %192 = vector.extract_strided_slice %191 {offsets = [0, 0], sizes = [8, 128], strides = [1, 1]} : vector<8x512xf32> to vector<8x128xf32>
    %193 = arith.negf %192 : vector<8x128xf32>
    %194 = math.exp %193 : vector<8x128xf32>
    %cst_57 = arith.constant 1.000000e+00 : f32
    %195 = vector.broadcast %cst_57 : f32 to vector<8x128xf32>
    %196 = arith.addf %195, %194 : vector<8x128xf32>
    %197 = arith.divf %195, %196 : vector<8x128xf32>
    %198 = vector.extract_strided_slice %191 {offsets = [0, 128], sizes = [8, 128], strides = [1, 1]} : vector<8x512xf32> to vector<8x128xf32>
    %199 = arith.negf %198 : vector<8x128xf32>
    %200 = math.exp %199 : vector<8x128xf32>
    %cst_58 = arith.constant 1.000000e+00 : f32
    %201 = vector.broadcast %cst_58 : f32 to vector<8x128xf32>
    %202 = arith.addf %201, %200 : vector<8x128xf32>
    %203 = arith.divf %201, %202 : vector<8x128xf32>
    %204 = vector.extract_strided_slice %191 {offsets = [0, 256], sizes = [8, 128], strides = [1, 1]} : vector<8x512xf32> to vector<8x128xf32>
    %205 = math.tanh %204 : vector<8x128xf32>
    %206 = vector.extract_strided_slice %191 {offsets = [0, 384], sizes = [8, 128], strides = [1, 1]} : vector<8x512xf32> to vector<8x128xf32>
    %207 = arith.negf %206 : vector<8x128xf32>
    %208 = math.exp %207 : vector<8x128xf32>
    %cst_59 = arith.constant 1.000000e+00 : f32
    %209 = vector.broadcast %cst_59 : f32 to vector<8x128xf32>
    %210 = arith.addf %209, %208 : vector<8x128xf32>
    %211 = arith.divf %209, %210 : vector<8x128xf32>
    %212 = arith.mulf %203, %170 : vector<8x128xf32>
    %213 = arith.mulf %197, %205 : vector<8x128xf32>
    %214 = arith.addf %212, %213 : vector<8x128xf32>
    %215 = math.tanh %214 : vector<8x128xf32>
    %216 = arith.mulf %211, %215 : vector<8x128xf32>
    %217 = vector.broadcast %7 : vector<1x128xf32> to vector<8x128xf32>
    %218 = arith.mulf %216, %217 : vector<8x128xf32>
    %cst_60 = arith.constant dense<0.000000e+00> : vector<8xf32>
    %219 = vector.multi_reduction <add>, %218, %cst_60 [1] : vector<8x128xf32> to vector<8xf32>
    %220 = vector.shape_cast %219 : vector<8xf32> to vector<8x1xf32>
    %c0_61 = arith.constant 0 : index
    %c0_62 = arith.constant 0 : index
    %221 = vector.load %arg5[%c0_61, %c0_62] : memref<1x1xf32, #tpu.memory_space<vmem>>, vector<1x1xf32>
    %222 = vector.broadcast %221 : vector<1x1xf32> to vector<8x1xf32>
    %223 = arith.addf %220, %222 : vector<8x1xf32>
    %c4_i32 = arith.constant 4 : i32
    %224 = vector.broadcast %c4_i32 : i32 to vector<1x8xi32>
    %225 = arith.cmpi eq, %8, %224 : vector<1x8xi32>
    %226 = arith.extui %225 : vector<1x8xi1> to vector<1x8xi32>
    %227 = arith.sitofp %226 : vector<1x8xi32> to vector<1x8xf32>
    %228 = vector.broadcast %223 : vector<8x1xf32> to vector<8x8xf32>
    %229 = vector.broadcast %227 : vector<1x8xf32> to vector<8x8xf32>
    %230 = arith.mulf %228, %229 : vector<8x8xf32>
    %231 = arith.addf %187, %230 : vector<8x8xf32>
    %c40 = arith.constant 40 : index
    %c0_63 = arith.constant 0 : index
    %232 = vector.load %arg7[%c40, %c0_63] : memref<64x512xf32, #tpu.memory_space<vmem>>, vector<8x512xf32>
    %c0_64 = arith.constant 0 : index
    %c0_65 = arith.constant 0 : index
    %233 = vector.load %arg2[%c0_64, %c0_65] : memref<128x512xf32, #tpu.memory_space<vmem>>, vector<128x512xf32>
    %cst_66 = arith.constant dense<0.000000e+00> : vector<8x512xf32>
    %234 = tpu.matmul %216, %233, %cst_66 {dimension_numbers = #tpu.dot_dimension_numbers<[1], [0], [0], [1], [0, 0, 1, 1], [], []>} : vector<8x128xf32>, vector<128x512xf32>, vector<8x512xf32> -> vector<8x512xf32>
    %235 = arith.addf %232, %234 : vector<8x512xf32>
    %236 = vector.extract_strided_slice %235 {offsets = [0, 0], sizes = [8, 128], strides = [1, 1]} : vector<8x512xf32> to vector<8x128xf32>
    %237 = arith.negf %236 : vector<8x128xf32>
    %238 = math.exp %237 : vector<8x128xf32>
    %cst_67 = arith.constant 1.000000e+00 : f32
    %239 = vector.broadcast %cst_67 : f32 to vector<8x128xf32>
    %240 = arith.addf %239, %238 : vector<8x128xf32>
    %241 = arith.divf %239, %240 : vector<8x128xf32>
    %242 = vector.extract_strided_slice %235 {offsets = [0, 128], sizes = [8, 128], strides = [1, 1]} : vector<8x512xf32> to vector<8x128xf32>
    %243 = arith.negf %242 : vector<8x128xf32>
    %244 = math.exp %243 : vector<8x128xf32>
    %cst_68 = arith.constant 1.000000e+00 : f32
    %245 = vector.broadcast %cst_68 : f32 to vector<8x128xf32>
    %246 = arith.addf %245, %244 : vector<8x128xf32>
    %247 = arith.divf %245, %246 : vector<8x128xf32>
    %248 = vector.extract_strided_slice %235 {offsets = [0, 256], sizes = [8, 128], strides = [1, 1]} : vector<8x512xf32> to vector<8x128xf32>
    %249 = math.tanh %248 : vector<8x128xf32>
    %250 = vector.extract_strided_slice %235 {offsets = [0, 384], sizes = [8, 128], strides = [1, 1]} : vector<8x512xf32> to vector<8x128xf32>
    %251 = arith.negf %250 : vector<8x128xf32>
    %252 = math.exp %251 : vector<8x128xf32>
    %cst_69 = arith.constant 1.000000e+00 : f32
    %253 = vector.broadcast %cst_69 : f32 to vector<8x128xf32>
    %254 = arith.addf %253, %252 : vector<8x128xf32>
    %255 = arith.divf %253, %254 : vector<8x128xf32>
    %256 = arith.mulf %247, %214 : vector<8x128xf32>
    %257 = arith.mulf %241, %249 : vector<8x128xf32>
    %258 = arith.addf %256, %257 : vector<8x128xf32>
    %259 = math.tanh %258 : vector<8x128xf32>
    %260 = arith.mulf %255, %259 : vector<8x128xf32>
    %261 = vector.broadcast %7 : vector<1x128xf32> to vector<8x128xf32>
    %262 = arith.mulf %260, %261 : vector<8x128xf32>
    %cst_70 = arith.constant dense<0.000000e+00> : vector<8xf32>
    %263 = vector.multi_reduction <add>, %262, %cst_70 [1] : vector<8x128xf32> to vector<8xf32>
    %264 = vector.shape_cast %263 : vector<8xf32> to vector<8x1xf32>
    %c0_71 = arith.constant 0 : index
    %c0_72 = arith.constant 0 : index
    %265 = vector.load %arg5[%c0_71, %c0_72] : memref<1x1xf32, #tpu.memory_space<vmem>>, vector<1x1xf32>
    %266 = vector.broadcast %265 : vector<1x1xf32> to vector<8x1xf32>
    %267 = arith.addf %264, %266 : vector<8x1xf32>
    %c5_i32 = arith.constant 5 : i32
    %268 = vector.broadcast %c5_i32 : i32 to vector<1x8xi32>
    %269 = arith.cmpi eq, %8, %268 : vector<1x8xi32>
    %270 = arith.extui %269 : vector<1x8xi1> to vector<1x8xi32>
    %271 = arith.sitofp %270 : vector<1x8xi32> to vector<1x8xf32>
    %272 = vector.broadcast %267 : vector<8x1xf32> to vector<8x8xf32>
    %273 = vector.broadcast %271 : vector<1x8xf32> to vector<8x8xf32>
    %274 = arith.mulf %272, %273 : vector<8x8xf32>
    %275 = arith.addf %231, %274 : vector<8x8xf32>
    %c48 = arith.constant 48 : index
    %c0_73 = arith.constant 0 : index
    %276 = vector.load %arg7[%c48, %c0_73] : memref<64x512xf32, #tpu.memory_space<vmem>>, vector<8x512xf32>
    %c0_74 = arith.constant 0 : index
    %c0_75 = arith.constant 0 : index
    %277 = vector.load %arg2[%c0_74, %c0_75] : memref<128x512xf32, #tpu.memory_space<vmem>>, vector<128x512xf32>
    %cst_76 = arith.constant dense<0.000000e+00> : vector<8x512xf32>
    %278 = tpu.matmul %260, %277, %cst_76 {dimension_numbers = #tpu.dot_dimension_numbers<[1], [0], [0], [1], [0, 0, 1, 1], [], []>} : vector<8x128xf32>, vector<128x512xf32>, vector<8x512xf32> -> vector<8x512xf32>
    %279 = arith.addf %276, %278 : vector<8x512xf32>
    %280 = vector.extract_strided_slice %279 {offsets = [0, 0], sizes = [8, 128], strides = [1, 1]} : vector<8x512xf32> to vector<8x128xf32>
    %281 = arith.negf %280 : vector<8x128xf32>
    %282 = math.exp %281 : vector<8x128xf32>
    %cst_77 = arith.constant 1.000000e+00 : f32
    %283 = vector.broadcast %cst_77 : f32 to vector<8x128xf32>
    %284 = arith.addf %283, %282 : vector<8x128xf32>
    %285 = arith.divf %283, %284 : vector<8x128xf32>
    %286 = vector.extract_strided_slice %279 {offsets = [0, 128], sizes = [8, 128], strides = [1, 1]} : vector<8x512xf32> to vector<8x128xf32>
    %287 = arith.negf %286 : vector<8x128xf32>
    %288 = math.exp %287 : vector<8x128xf32>
    %cst_78 = arith.constant 1.000000e+00 : f32
    %289 = vector.broadcast %cst_78 : f32 to vector<8x128xf32>
    %290 = arith.addf %289, %288 : vector<8x128xf32>
    %291 = arith.divf %289, %290 : vector<8x128xf32>
    %292 = vector.extract_strided_slice %279 {offsets = [0, 256], sizes = [8, 128], strides = [1, 1]} : vector<8x512xf32> to vector<8x128xf32>
    %293 = math.tanh %292 : vector<8x128xf32>
    %294 = vector.extract_strided_slice %279 {offsets = [0, 384], sizes = [8, 128], strides = [1, 1]} : vector<8x512xf32> to vector<8x128xf32>
    %295 = arith.negf %294 : vector<8x128xf32>
    %296 = math.exp %295 : vector<8x128xf32>
    %cst_79 = arith.constant 1.000000e+00 : f32
    %297 = vector.broadcast %cst_79 : f32 to vector<8x128xf32>
    %298 = arith.addf %297, %296 : vector<8x128xf32>
    %299 = arith.divf %297, %298 : vector<8x128xf32>
    %300 = arith.mulf %291, %258 : vector<8x128xf32>
    %301 = arith.mulf %285, %293 : vector<8x128xf32>
    %302 = arith.addf %300, %301 : vector<8x128xf32>
    %303 = math.tanh %302 : vector<8x128xf32>
    %304 = arith.mulf %299, %303 : vector<8x128xf32>
    %305 = vector.broadcast %7 : vector<1x128xf32> to vector<8x128xf32>
    %306 = arith.mulf %304, %305 : vector<8x128xf32>
    %cst_80 = arith.constant dense<0.000000e+00> : vector<8xf32>
    %307 = vector.multi_reduction <add>, %306, %cst_80 [1] : vector<8x128xf32> to vector<8xf32>
    %308 = vector.shape_cast %307 : vector<8xf32> to vector<8x1xf32>
    %c0_81 = arith.constant 0 : index
    %c0_82 = arith.constant 0 : index
    %309 = vector.load %arg5[%c0_81, %c0_82] : memref<1x1xf32, #tpu.memory_space<vmem>>, vector<1x1xf32>
    %310 = vector.broadcast %309 : vector<1x1xf32> to vector<8x1xf32>
    %311 = arith.addf %308, %310 : vector<8x1xf32>
    %c6_i32 = arith.constant 6 : i32
    %312 = vector.broadcast %c6_i32 : i32 to vector<1x8xi32>
    %313 = arith.cmpi eq, %8, %312 : vector<1x8xi32>
    %314 = arith.extui %313 : vector<1x8xi1> to vector<1x8xi32>
    %315 = arith.sitofp %314 : vector<1x8xi32> to vector<1x8xf32>
    %316 = vector.broadcast %311 : vector<8x1xf32> to vector<8x8xf32>
    %317 = vector.broadcast %315 : vector<1x8xf32> to vector<8x8xf32>
    %318 = arith.mulf %316, %317 : vector<8x8xf32>
    %319 = arith.addf %275, %318 : vector<8x8xf32>
    %c56 = arith.constant 56 : index
    %c0_83 = arith.constant 0 : index
    %320 = vector.load %arg7[%c56, %c0_83] : memref<64x512xf32, #tpu.memory_space<vmem>>, vector<8x512xf32>
    %c0_84 = arith.constant 0 : index
    %c0_85 = arith.constant 0 : index
    %321 = vector.load %arg2[%c0_84, %c0_85] : memref<128x512xf32, #tpu.memory_space<vmem>>, vector<128x512xf32>
    %cst_86 = arith.constant dense<0.000000e+00> : vector<8x512xf32>
    %322 = tpu.matmul %304, %321, %cst_86 {dimension_numbers = #tpu.dot_dimension_numbers<[1], [0], [0], [1], [0, 0, 1, 1], [], []>} : vector<8x128xf32>, vector<128x512xf32>, vector<8x512xf32> -> vector<8x512xf32>
    %323 = arith.addf %320, %322 : vector<8x512xf32>
    %324 = vector.extract_strided_slice %323 {offsets = [0, 0], sizes = [8, 128], strides = [1, 1]} : vector<8x512xf32> to vector<8x128xf32>
    %325 = arith.negf %324 : vector<8x128xf32>
    %326 = math.exp %325 : vector<8x128xf32>
    %cst_87 = arith.constant 1.000000e+00 : f32
    %327 = vector.broadcast %cst_87 : f32 to vector<8x128xf32>
    %328 = arith.addf %327, %326 : vector<8x128xf32>
    %329 = arith.divf %327, %328 : vector<8x128xf32>
    %330 = vector.extract_strided_slice %323 {offsets = [0, 128], sizes = [8, 128], strides = [1, 1]} : vector<8x512xf32> to vector<8x128xf32>
    %331 = arith.negf %330 : vector<8x128xf32>
    %332 = math.exp %331 : vector<8x128xf32>
    %cst_88 = arith.constant 1.000000e+00 : f32
    %333 = vector.broadcast %cst_88 : f32 to vector<8x128xf32>
    %334 = arith.addf %333, %332 : vector<8x128xf32>
    %335 = arith.divf %333, %334 : vector<8x128xf32>
    %336 = vector.extract_strided_slice %323 {offsets = [0, 256], sizes = [8, 128], strides = [1, 1]} : vector<8x512xf32> to vector<8x128xf32>
    %337 = math.tanh %336 : vector<8x128xf32>
    %338 = vector.extract_strided_slice %323 {offsets = [0, 384], sizes = [8, 128], strides = [1, 1]} : vector<8x512xf32> to vector<8x128xf32>
    %339 = arith.negf %338 : vector<8x128xf32>
    %340 = math.exp %339 : vector<8x128xf32>
    %cst_89 = arith.constant 1.000000e+00 : f32
    %341 = vector.broadcast %cst_89 : f32 to vector<8x128xf32>
    %342 = arith.addf %341, %340 : vector<8x128xf32>
    %343 = arith.divf %341, %342 : vector<8x128xf32>
    %344 = arith.mulf %335, %302 : vector<8x128xf32>
    %345 = arith.mulf %329, %337 : vector<8x128xf32>
    %346 = arith.addf %344, %345 : vector<8x128xf32>
    %347 = math.tanh %346 : vector<8x128xf32>
    %348 = arith.mulf %343, %347 : vector<8x128xf32>
    %349 = vector.broadcast %7 : vector<1x128xf32> to vector<8x128xf32>
    %350 = arith.mulf %348, %349 : vector<8x128xf32>
    %cst_90 = arith.constant dense<0.000000e+00> : vector<8xf32>
    %351 = vector.multi_reduction <add>, %350, %cst_90 [1] : vector<8x128xf32> to vector<8xf32>
    %352 = vector.shape_cast %351 : vector<8xf32> to vector<8x1xf32>
    %c0_91 = arith.constant 0 : index
    %c0_92 = arith.constant 0 : index
    %353 = vector.load %arg5[%c0_91, %c0_92] : memref<1x1xf32, #tpu.memory_space<vmem>>, vector<1x1xf32>
    %354 = vector.broadcast %353 : vector<1x1xf32> to vector<8x1xf32>
    %355 = arith.addf %352, %354 : vector<8x1xf32>
    %c7_i32 = arith.constant 7 : i32
    %356 = vector.broadcast %c7_i32 : i32 to vector<1x8xi32>
    %357 = arith.cmpi eq, %8, %356 : vector<1x8xi32>
    %358 = arith.extui %357 : vector<1x8xi1> to vector<1x8xi32>
    %359 = arith.sitofp %358 : vector<1x8xi32> to vector<1x8xf32>
    %360 = vector.broadcast %355 : vector<8x1xf32> to vector<8x8xf32>
    %361 = vector.broadcast %359 : vector<1x8xf32> to vector<8x8xf32>
    %362 = arith.mulf %360, %361 : vector<8x8xf32>
    %363 = arith.addf %319, %362 : vector<8x8xf32>
    %cst_93 = arith.constant dense<0xFF800000> : vector<8xf32>
    %364 = vector.multi_reduction <maximumf>, %363, %cst_93 [1] : vector<8x8xf32> to vector<8xf32>
    %365 = vector.shape_cast %364 : vector<8xf32> to vector<8x1xf32>
    %366 = vector.broadcast %365 : vector<8x1xf32> to vector<8x8xf32>
    %367 = arith.subf %363, %366 : vector<8x8xf32>
    %368 = math.exp %367 : vector<8x8xf32>
    %cst_94 = arith.constant dense<0.000000e+00> : vector<8xf32>
    %369 = vector.multi_reduction <add>, %368, %cst_94 [1] : vector<8x8xf32> to vector<8xf32>
    %370 = vector.shape_cast %369 : vector<8xf32> to vector<8x1xf32>
    %371 = vector.broadcast %370 : vector<8x1xf32> to vector<8x8xf32>
    %372 = arith.divf %368, %371 : vector<8x8xf32>
    %c0_95 = arith.constant 0 : index
    %c0_96 = arith.constant 0 : index
    %373 = vector.load %arg6[%c0_95, %c0_96] : memref<8x8xf32, #tpu.memory_space<vmem>>, vector<8x8xf32>
    tpu.vector_store %arg6[%c0_95, %c0_96], %372 {strides = array<i32>} : memref<8x8xf32, #tpu.memory_space<vmem>>, vector<8x8xf32>,
    return
  }
}

</mosaic_0001>

<bundles_post_ra>
// kernel: tpu_custom_call.1
= control target key start
LH: loop header
LB: loop body
LE: loop exit
PB: predicated region body
PF: predicated region fallthrough
CT: control target
= control target key end

     0   :  { %s3374_s0 = inlined_call_operand.vmem [shape: f32[64,16], index: 0, kind: input, shape index: {}]   ;;  %s3375_s1 = inlined_call_operand.vmem [shape: f32[16,512], index: 1, kind: input, shape index: {}]   ;;  %s3376_s2 = inlined_call_operand.hbm [shape: f32[128,512], index: 2, kind: input, shape index: {}]   ;;  %s3377_s3 = inlined_call_operand.vmem [shape: f32[1,512], index: 3, kind: input, shape index: {}]   ;;  %s3378_s4 = inlined_call_operand.vmem [shape: f32[1,128], index: 4, kind: input, shape index: {}]   ;;  %s3379_s5 = inlined_call_operand.<no memory space> [shape: f32[1,1], index: 5, kind: input, shape index: {}]   ;;  %s3380_s6 = inlined_call_operand.hbm [shape: f32[8,8], index: 6, kind: output, shape index: {}]  }
   0x1   :  { %v11_v0 = vstv %s3379_s5 }
   0x2   :  { %12 = vst [vmem:[#allocation3] sm:$0x1] %v11_v0 }
   0x3   :  { %13 = vsyncpa [#allocation5], 0 }
   0x4   :  { %14 = vsyncpa [#allocation6], 0  ;;  %s2795_s23 = smov [#allocation4]   ;;  %s2747_s27 = scalar_lea.hbm %s3376_s2, 8192 }
   0x5   :  { %s24_s24 = sshll.u32 %s2795_s23, 4  ;;  %p2748_p0 = scmp.ne.s32.totalorder %s3376_s2, %s2747_s27  ;;  %s25_s24 = int_to_ptr.vmem [resolvable:$true] %s24_s24 }
   0x6   :  { %p2751_p1 = scmp.lt.u32.totalorder %s2747_s27, %s3376_s2 }
   0x8   :  { %p2753_p2 = pnand %p2751_p1, %p2748_p0 }
   0xa   :  { %2756 = shalt.err (!%p2753_p2)
}
   0xb   :  { %s2757_s5 = scalar_lea.vmem %s25_s24, 8192  ;;  %p2762_p4 = scmp.lt.s32.totalorder %s25_s24, %s25_s24 }
   0xc   :  { %p2758_p3 = scmp.ne.s32.totalorder %s25_s24, %s2757_s5  ;;  %p2763_p5 = scmp.lt.s32.totalorder %s2757_s5, %s2757_s5 }
   0xe   :  { %p2764_p6 = por %p2763_p5, %p2762_p4 }
  0x10   :  { %p2765_p7 = pnand %p2764_p6, %p2758_p3 }
  0x12   :  { %2768 = shalt.err (!%p2765_p7)
}
  0x13   :  { %s2796_s8 = smov 512   ;;  %s2797_s9 = smov 32  }
  0x14   :  { %30 = dma.hbm_to_vmem [thread:$0]  %s3376_s2, 8192, %s25_s24, [#allocation5], %s2796_s8, %s2796_s8, %s2797_s9  }
  0x15   :  { %2791 = dma.done.wait [#allocation5], 8192  }
  0x16   :  { %2792 = vsyncadd [#allocation5], 4294959104  ;;  %v2798_v1 = vmov 0.0   ;;  %v49_v2 = vld [vmem:[%s3375_s1 + $0x8] sm:$0xff]  ;;  %v51_v4 = vld [vmem:[%s3375_s1 + $0x18] sm:$0xff]  ;;  %vm78_vm0 = vcmask 130048  }
  0x17   :  { %167 = vmatprep.mubr.f32.mxu0 %v2798_v1  ;;  %280 = vmatprep.mubr.f32.mxu1 %v2798_v1  ;;  %v53_v3 = vld [vmem:[%s3375_s1 + $0x28] sm:$0xff]  ;;  %v55_v6 = vld [vmem:[%s3375_s1 + $0x38] sm:$0xff]  ;;  %v48_v7 = vld [vmem:[%s3375_s1] sm:$0xff]  ;;  %vm1945_vm9 = vcmask 64512  }
  0x18   :  { %v2023_v5 = vpack.c.bf16 %v53_v3, %v49_v2  ;;  %v52_v8 = vld [vmem:[%s3375_s1 + $0x20] sm:$0xff]  ;;  %v2027_v9 = vpack.c.bf16 %v55_v6, %v51_v4  ;;  %v50_v11 = vld [vmem:[%s3375_s1 + $0x10] sm:$0xff]  ;;  %v41_v34 = vld [vmem:[%s3374_s0 + $0x8] sm:$0xff] }
  0x19   :  { %v2025_v10 = vpack.c.bf16 %v52_v8, %v48_v7  ;;  %v54_v12 = vld [vmem:[%s3375_s1 + $0x30] sm:$0xff]  ;;  %v40_v13 = vld [vmem:[%s3374_s0] sm:$0xff]  ;;  %v43_v2 = vld [vmem:[%s3374_s0 + $0x18] sm:$0xff] }
  0x1a   :  { %2024 = vmatprep.subr.bf16.mxu0 %v2023_v5  ;;  %v2029_v14 = vpack.c.bf16 %v54_v12, %v50_v11  ;;  %v369_v15 = vld [vmem:[#allocation4 + $0x8] sm:$0xff]  ;;  %v371_v17 = vld [vmem:[#allocation4 + $0x18] sm:$0xff]  ;;  %2028 = vmatprep.subr.bf16.mxu1 %v2027_v9  ;;  %v368_v20 = vld [vmem:[#allocation4] sm:$0xff] }
  0x1b   :  { %v373_v16 = vld [vmem:[#allocation4 + $0x28] sm:$0xff]  ;;  %2026 = vmatpush1.bf16.msra.mxu0 %v2025_v10  ;;  %v375_v19 = vld [vmem:[#allocation4 + $0x38] sm:$0xff]  ;;  %v372_v21 = vld [vmem:[#allocation4 + $0x20] sm:$0xff] }
  0x1c   :  { %v2880_v18 = vpack.c.bf16 %v373_v16, %v369_v15  ;;  %2030 = vmatpush1.bf16.msra.mxu1 %v2029_v14  ;;  %v2882_v22 = vpack.c.bf16 %v375_v19, %v371_v17  ;;  %v2884_v23 = vpack.c.bf16 %v372_v21, %v368_v20  ;;  %v370_v24 = vld [vmem:[#allocation4 + $0x10] sm:$0xff]  ;;  %v377_v27 = vld [vmem:[#allocation4 + $0x48] sm:$0xff]  ;;  %v379_v29 = vld [vmem:[#allocation4 + $0x58] sm:$0xff] }
  0x1d   :  { %v374_v25 = vld [vmem:[#allocation4 + $0x30] sm:$0xff]  ;;  %v381_v28 = vld [vmem:[#allocation4 + $0x68] sm:$0xff]  ;;  %v383_v31 = vld [vmem:[#allocation4 + $0x78] sm:$0xff] }
  0x1e   :  { %2032 = vmatprep.subr.bf16.mxu0 %v2880_v18  ;;  %v2887_v26 = vpack.c.bf16 %v374_v25, %v370_v24  ;;  %1973 = vmatmul.mubr.msk.f32.vlgmr.msra.gmra.mrb[0].mxu0 %vm78_vm0, %v40_v13  ;;  %v2891_v30 = vpack.c.bf16 %v381_v28, %v377_v27  ;;  %v376_v32 = vld [vmem:[#allocation4 + $0x40] sm:$0xff]  ;;  %v2898_v35 = vpack.c.bf16 %v383_v31, %v379_v29  ;;  %v378_v37 = vld [vmem:[#allocation4 + $0x50] sm:$0xff]  ;;  %v385_v40 = vld [vmem:[#allocation4 + $0x88] sm:$0xff] }
  0x1f   :  { %2064 = vmatprep.subr.bf16.mxu1 %v2882_v22  ;;  %v380_v33 = vld [vmem:[#allocation4 + $0x60] sm:$0xff]  ;;  %1981 = vmatmul.mubr.msk.f32.vlgmr.msra.gmra.mrb[0].mxu1 %vm78_vm0, %v40_v13  ;;  %v382_v38 = vld [vmem:[#allocation4 + $0x70] sm:$0xff]  ;;  %v389_v41 = vld [vmem:[#allocation4 + $0xa8] sm:$0xff] }
  0x20   :  { %2034 = vmatpush1.bf16.msra.mxu0 %v2884_v23  ;;  %v2900_v36 = vpack.c.bf16 %v380_v33, %v376_v32  ;;  %2066 = vmatpush1.bf16.msra.mxu1 %v2887_v26  ;;  %v2904_v39 = vpack.c.bf16 %v382_v38, %v378_v37  ;;  %v387_v42 = vld [vmem:[#allocation4 + $0x98] sm:$0xff]  ;;  %v2908_v43 = vpack.c.bf16 %v389_v41, %v385_v40  ;;  %v384_v45 = vld [vmem:[#allocation4 + $0x80] sm:$0xff]  ;;  %v42_v47 = vld [vmem:[%s3374_s0 + $0x10] sm:$0xff] }
  0x21   :  { %173 = vmatprep.mubr.f32.mxu0 %v2798_v1  ;;  %286 = vmatprep.mubr.f32.mxu1 %v2798_v1  ;;  %v391_v44 = vld [vmem:[#allocation4 + $0xb8] sm:$0xff]  ;;  %v388_v46 = vld [vmem:[#allocation4 + $0xa0] sm:$0xff]  ;;  %v386_v49 = vld [vmem:[#allocation4 + $0x90] sm:$0xff] }
  0x22   :  { %2036 = vmatprep.subr.bf16.mxu0 %v2891_v30  ;;  %1974 = vmatmul.mubr.msk.f32.gmra.mrb[2].mxu0 %vm78_vm0, %v41_v34  ;;  %v2915_v48 = vpack.c.bf16 %v391_v44, %v387_v42  ;;  %v390_v50 = vld [vmem:[#allocation4 + $0xb0] sm:$0xff]  ;;  %v2919_v51 = vpack.c.bf16 %v388_v46, %v384_v45  ;;  %v393_v52 = vld [vmem:[#allocation4 + $0xc8] sm:$0xff]  ;;  %v395_v54 = vld [vmem:[#allocation4 + $0xd8] sm:$0xff] }
  0x23   :  { %2068 = vmatprep.subr.bf16.mxu1 %v2898_v35  ;;  %1982 = vmatmul.mubr.msk.f32.gmra.mrb[2].mxu1 %vm78_vm0, %v41_v34  ;;  %v397_v53 = vld [vmem:[#allocation4 + $0xe8] sm:$0xff]  ;;  %v2923_v55 = vpack.c.bf16 %v390_v50, %v386_v49  ;;  %v399_v56 = vld [vmem:[#allocation4 + $0xf8] sm:$0xff]  ;;  %v392_v57 = vld [vmem:[#allocation4 + $0xc0] sm:$0xff] }
  0x24   :  { %2038 = vmatpush1.bf16.msra.mxu0 %v2900_v36  ;;  %2070 = vmatpush1.bf16.msra.mxu1 %v2904_v39  ;;  %v396_v58 = vld [vmem:[#allocation4 + $0xe0] sm:$0xff]  ;;  %v2927_v59 = vpack.c.bf16 %v397_v53, %v393_v52  ;;  %v394_v60 = vld [vmem:[#allocation4 + $0xd0] sm:$0xff]  ;;  %v2931_v62 = vpack.c.bf16 %v399_v56, %v395_v54  ;;  %v401_v63 = vld [vmem:[#allocation4 + $0x108] sm:$0xff] }
  0x25   :  { %179 = vmatprep.mubr.f32.mxu0 %v2798_v1  ;;  %292 = vmatprep.mubr.f32.mxu1 %v2798_v1  ;;  %v398_v61 = vld [vmem:[#allocation4 + $0xf0] sm:$0xff]  ;;  %v405_v0 = vld [vmem:[#allocation4 + $0x128] sm:$0xff]  ;;  %v2938_v3 = vpack.c.bf16 %v396_v58, %v392_v57  ;;  %v403_v4 = vld [vmem:[#allocation4 + $0x118] sm:$0xff] }
  0x26   :  { %2040 = vmatprep.subr.bf16.mxu0 %v2908_v43  ;;  %1975 = vmatmul.mubr.msk.f32.gmra.mrb[4].mxu0 %vm78_vm0, %v42_v47  ;;  %v407_v5 = vld [vmem:[#allocation4 + $0x138] sm:$0xff]  ;;  %v2942_v6 = vpack.c.bf16 %v398_v61, %v394_v60  ;;  %v400_v7 = vld [vmem:[#allocation4 + $0x100] sm:$0xff]  ;;  %v2946_v9 = vpack.c.bf16 %v405_v0, %v401_v63  ;;  %v402_v10 = vld [vmem:[#allocation4 + $0x110] sm:$0xff] }
  0x27   :  { %2072 = vmatprep.subr.bf16.mxu1 %v2915_v48  ;;  %1983 = vmatmul.mubr.msk.f32.gmra.mrb[4].mxu1 %vm78_vm0, %v42_v47  ;;  %v404_v8 = vld [vmem:[#allocation4 + $0x120] sm:$0xff]  ;;  %v406_v11 = vld [vmem:[#allocation4 + $0x130] sm:$0xff]  ;;  %v2950_v12 = vpack.c.bf16 %v407_v5, %v403_v4  ;;  %v409_v13 = vld [vmem:[#allocation4 + $0x148] sm:$0xff] }
  0x28   :  { %2042 = vmatpush1.bf16.msra.mxu0 %v2919_v51  ;;  %2074 = vmatpush1.bf16.msra.mxu1 %v2923_v55  ;;  %v413_v14 = vld [vmem:[#allocation4 + $0x168] sm:$0xff]  ;;  %v44_v15 = vld [vmem:[%s3374_s0 + $0x20] sm:$0xff]  ;;  %v2957_v16 = vpack.c.bf16 %v404_v8, %v400_v7  ;;  %v2961_v20 = vpack.c.bf16 %v406_v11, %v402_v10  ;;  %v410_v27 = vld [vmem:[#allocation4 + $0x150] sm:$0xff]  ;;  %v58_v8 = vlaneseq }
  0x29   :  { %185 = vmatprep.mubr.f32.mxu0 %v2798_v1  ;;  %298 = vmatprep.mubr.f32.mxu1 %v2798_v1  ;;  %v411_v17 = vld [vmem:[#allocation4 + $0x158] sm:$0xff]  ;;  %v408_v21 = vld [vmem:[#allocation4 + $0x140] sm:$0xff]  ;;  %v2965_v25 = vpack.c.bf16 %v413_v14, %v409_v13  ;;  %v414_v28 = vld [vmem:[#allocation4 + $0x170] sm:$0xff] }
  0x2a   :  { %2044 = vmatprep.subr.bf16.mxu0 %v2927_v59  ;;  %1976 = vmatmul.mubr.msk.f32.gmra.mrb[6].mxu0 %vm78_vm0, %v43_v2  ;;  %v415_v19 = vld [vmem:[#allocation4 + $0x178] sm:$0xff]  ;;  %v412_v24 = vld [vmem:[#allocation4 + $0x160] sm:$0xff]  ;;  %v417_v31 = vld [vmem:[#allocation4 + $0x188] sm:$0xff]  ;;  %v2980_v40 = vpack.c.bf16 %v414_v28, %v410_v27  ;;  %v59_v10 = vshrl.u32 %v58_v8, 7 }
  0x2b   :  { %2076 = vmatprep.subr.bf16.mxu1 %v2931_v62  ;;  %1984 = vmatmul.mubr.msk.f32.gmra.mrb[6].mxu1 %vm78_vm0, %v43_v2  ;;  %v2969_v29 = vpack.c.bf16 %v415_v19, %v411_v17  ;;  %v421_v32 = vld [vmem:[#allocation4 + $0x1a8] sm:$0xff]  ;;  %v2976_v34 = vpack.c.bf16 %v412_v24, %v408_v21  ;;  %v419_v37 = vld [vmem:[#allocation4 + $0x198] sm:$0xff]  ;;  %v416_v41 = vld [vmem:[#allocation4 + $0x180] sm:$0xff] }
  0x2c   :  { %2046 = vmatpush1.bf16.msra.mxu0 %v2938_v3  ;;  %2078 = vmatpush1.bf16.msra.mxu1 %v2942_v6  ;;  %v45_v33 = vld [vmem:[%s3374_s0 + $0x28] sm:$0xff]  ;;  %v423_v38 = vld [vmem:[#allocation4 + $0x1b8] sm:$0xff]  ;;  %v2984_v44 = vpack.c.bf16 %v421_v32, %v417_v31  ;;  %v418_v45 = vld [vmem:[#allocation4 + $0x190] sm:$0xff]  ;;  %v60_v11 = vsub.s32 0, %v59_v10  ;;  %v64_v14 = vsub.s32 1, %v59_v10  ;;  %v72_v21 = vsub.s32 3, %v59_v10 }
  0x2d   :  { %191 = vmatprep.mubr.f32.mxu0 %v2798_v1  ;;  %304 = vmatprep.mubr.f32.mxu1 %v2798_v1  ;;  %v420_v42 = vld [vmem:[#allocation4 + $0x1a0] sm:$0xff]  ;;  %v422_v46 = vld [vmem:[#allocation4 + $0x1b0] sm:$0xff]  ;;  %v2988_v47 = vpack.c.bf16 %v423_v38, %v419_v37  ;;  %v425_v49 = vld [vmem:[#allocation4 + $0x1c8] sm:$0xff] }
  0x2e   :  { %2048 = vmatprep.subr.bf16.mxu0 %v2946_v9  ;;  %1977 = vmatmul.mubr.msk.f32.gmra.mrb[8].mxu0 %vm78_vm0, %v44_v15  ;;  %v429_v50 = vld [vmem:[#allocation4 + $0x1e8] sm:$0xff]  ;;  %v2995_v53 = vpack.c.bf16 %v420_v42, %v416_v41  ;;  %v427_v54 = vld [vmem:[#allocation4 + $0x1d8] sm:$0xff]  ;;  %v2999_v57 = vpack.c.bf16 %v422_v46, %v418_v45  ;;  %v424_v58 = vld [vmem:[#allocation4 + $0x1c0] sm:$0xff]  ;;  %v68_v41 = vsub.s32 2, %v59_v10 }
  0x2f   :  { %2080 = vmatprep.subr.bf16.mxu1 %v2950_v12  ;;  %1985 = vmatmul.mubr.msk.f32.gmra.mrb[8].mxu1 %vm78_vm0, %v44_v15  ;;  %v46_v52 = vld [vmem:[%s3374_s0 + $0x30] sm:$0xff]  ;;  %v431_v56 = vld [vmem:[#allocation4 + $0x1f8] sm:$0xff]  ;;  %v428_v60 = vld [vmem:[#allocation4 + $0x1e0] sm:$0xff]  ;;  %v3003_v61 = vpack.c.bf16 %v429_v50, %v425_v49 }
  0x30   :  { %2050 = vmatpush1.bf16.msra.mxu0 %v2957_v16  ;;  %2082 = vmatpush1.bf16.msra.mxu1 %v2961_v20  ;;  %v426_v63 = vld [vmem:[#allocation4 + $0x1d0] sm:$0xff]  ;;  %v3007_v2 = vpack.c.bf16 %v431_v56, %v427_v54  ;;  %v3014_v5 = vpack.c.bf16 %v428_v60, %v424_v58  ;;  %v56_v13 = vld [vmem:[%s3377_s3] sm:$0xf] }
  0x31   :  { %197 = vmatprep.mubr.f32.mxu0 %v2798_v1  ;;  %310 = vmatprep.mubr.f32.mxu1 %v2798_v1  ;;  %v430_v0 = vld [vmem:[#allocation4 + $0x1f0] sm:$0xff]  ;;  %v3071_v15 = vrot.slane %v56_v13, %v60_v11  ;;  %v3073_v17 = vrot.slane %v56_v13, %v64_v14  ;;  %v3077_v38 = vrot.slane %v56_v13, %v72_v21  ;;  %v3089_v21 = vld [vmem:[%s3378_s4] ss:$0 sm:$0xff]  ;;  %s2800_s4 = smov [#allocation7]  }
  0x32   :  { %2052 = vmatprep.subr.bf16.mxu0 %v2965_v25  ;;  %1978 = vmatmul.mubr.msk.f32.gmra.mrb[10].mxu0 %vm78_vm0, %v45_v33  ;;  %v47_v4 = vld [vmem:[%s3374_s0 + $0x38] sm:$0xff]  ;;  %v3018_v7 = vpack.c.bf16 %v430_v0, %v426_v63  ;;  %v3080_v45 = vrot.slane %v56_v13, %v68_v41  ;;  %s1964_s18 = sshll.u32 %s2800_s4, 4  ;;  %s1965_s18 = int_to_ptr.vmem [resolvable:$true] %s1964_s18 }
  0x33   :  { %2084 = vmatprep.subr.bf16.mxu1 %v2969_v29  ;;  %1986 = vmatmul.mubr.msk.f32.gmra.mrb[10].mxu1 %vm78_vm0, %v45_v33  ;;  %s2769_s19 = scalar_lea.vmem %s1965_s18, 128  ;;  %p2774_p9 = scmp.lt.s32.totalorder %s1965_s18, %s1965_s18 }
  0x34   :  { %2054 = vmatpush1.bf16.msra.mxu0 %v2976_v34  ;;  %2086 = vmatpush1.bf16.msra.mxu1 %v2980_v40  ;;  %p2770_p8 = scmp.ne.s32.totalorder %s1965_s18, %s2769_s19  ;;  %p2775_p10 = scmp.lt.s32.totalorder %s2769_s19, %s2769_s19 }
  0x35   :  { %203 = vmatprep.mubr.f32.mxu0 %v2798_v1  ;;  %316 = vmatprep.mubr.f32.mxu1 %v2798_v1 }
  0x36   :  { %2056 = vmatprep.subr.bf16.mxu0 %v2984_v44  ;;  %1979 = vmatmul.mubr.msk.f32.gmra.mrb[12].mxu0 %vm78_vm0, %v46_v52  ;;  %p2776_p11 = por %p2775_p10, %p2774_p9 }
  0x37   :  { %2088 = vmatprep.subr.bf16.mxu1 %v2988_v47  ;;  %1987 = vmatmul.mubr.msk.f32.gmra.mrb[12].mxu1 %vm78_vm0, %v46_v52 }
  0x38   :  { %2058 = vmatpush1.bf16.msra.mxu0 %v2995_v53  ;;  %2090 = vmatpush1.bf16.msra.mxu1 %v2999_v57  ;;  %p2777_p12 = pnand %p2776_p11, %p2770_p8 }
  0x39   :  { %209 = vmatprep.mubr.f32.mxu0 %v2798_v1  ;;  %322 = vmatprep.mubr.f32.mxu1 %v2798_v1 }
  0x3a   :  { %2060 = vmatprep.subr.bf16.mxu0 %v3003_v61  ;;  %1980 = vmatmul.mubr.msk.f32.gmra.mrb[14].mxu0 %vm78_vm0, %v47_v4 }
  0x3b   :  { %2092 = vmatprep.subr.bf16.mxu1 %v3007_v2  ;;  %1988 = vmatmul.mubr.msk.f32.gmra.mrb[14].mxu1 %vm78_vm0, %v47_v4 }
  0x3c   :  { %2062 = vmatpush1.bf16.msra.mxu0 %v3014_v5  ;;  %2094 = vmatpush1.bf16.msra.mxu1 %v3018_v7 }
  0x3d   :  { %496 = vmatprep.mubr.f32.mxu0 %v2798_v1  ;;  %567 = vmatprep.mubr.f32.mxu1 %v2798_v1 }
  0x3e   :  { %2096 = vmatprep.subr.bf16.mxu0 %v2880_v18  ;;  %2128 = vmatprep.subr.bf16.mxu1 %v2882_v22 }
  0x3f   :  { %497 = vmatmul.mubr.f32.vlgmr.msra.gmra.mrb[0].mxu0 %v2798_v1  ;;  %568 = vmatmul.mubr.f32.vlgmr.msra.gmra.mrb[0].mxu1 %v2798_v1 }
  0x40   :  { %2098 = vmatpush1.bf16.msra.mxu0 %v2884_v23  ;;  %2130 = vmatpush1.bf16.msra.mxu1 %v2887_v26 }
  0x41   :  { %2100 = vmatprep.subr.bf16.mxu0 %v2891_v30  ;;  %2132 = vmatprep.subr.bf16.mxu1 %v2898_v35 }
  0x42   :  { %697 = vmatprep.mubr.f32.mxu0 %v2798_v1  ;;  %768 = vmatprep.mubr.f32.mxu1 %v2798_v1 }
  0x44   :  { %2102 = vmatpush1.bf16.msra.mxu0 %v2900_v36  ;;  %2134 = vmatpush1.bf16.msra.mxu1 %v2904_v39 }
  0x45   :  { %2104 = vmatprep.subr.bf16.mxu0 %v2908_v43  ;;  %2136 = vmatprep.subr.bf16.mxu1 %v2915_v48 }
  0x48   :  { %2106 = vmatpush1.bf16.msra.mxu0 %v2919_v51  ;;  %2138 = vmatpush1.bf16.msra.mxu1 %v2923_v55 }
  0x49   :  { %2108 = vmatprep.subr.bf16.mxu0 %v2927_v59  ;;  %2140 = vmatprep.subr.bf16.mxu1 %v2931_v62 }
  0x4c   :  { %2110 = vmatpush1.bf16.msra.mxu0 %v2938_v3  ;;  %2142 = vmatpush1.bf16.msra.mxu1 %v2942_v6 }
  0x4d   :  { %2112 = vmatprep.subr.bf16.mxu0 %v2946_v9  ;;  %2144 = vmatprep.subr.bf16.mxu1 %v2950_v12 }
  0x50   :  { %2114 = vmatpush1.bf16.msra.mxu0 %v2957_v16  ;;  %2146 = vmatpush1.bf16.msra.mxu1 %v2961_v20 }
  0x51   :  { %2116 = vmatprep.subr.bf16.mxu0 %v2965_v25  ;;  %2148 = vmatprep.subr.bf16.mxu1 %v2969_v29 }
  0x54   :  { %2118 = vmatpush1.bf16.msra.mxu0 %v2976_v34  ;;  %2150 = vmatpush1.bf16.msra.mxu1 %v2980_v40 }
  0x55   :  { %2120 = vmatprep.subr.bf16.mxu0 %v2984_v44  ;;  %2152 = vmatprep.subr.bf16.mxu1 %v2988_v47 }
  0x58   :  { %2122 = vmatpush1.bf16.msra.mxu0 %v2995_v53  ;;  %2154 = vmatpush1.bf16.msra.mxu1 %v2999_v57 }
  0x59   :  { %2124 = vmatprep.subr.bf16.mxu0 %v3003_v61  ;;  %2156 = vmatprep.subr.bf16.mxu1 %v3007_v2 }
  0x5c   :  { %2126 = vmatpush1.bf16.msra.mxu0 %v3014_v5  ;;  %2158 = vmatpush1.bf16.msra.mxu1 %v3018_v7 }
  0x5d   :  { %2160 = vmatprep.subr.bf16.mxu0 %v2880_v18  ;;  %2192 = vmatprep.subr.bf16.mxu1 %v2882_v22 }
 0x112   :  { %v498_v19 = vpop.f32.mrb[0].mxu0  ;;  %v569_v27 = vpop.f32.mrb[0].mxu1 }
 0x113   :  { %v2543_v24 = vadd.f32 %v498_v19, %v3071_v15  ;;  %v500_v28 = vpop.f32.mrb[1].mxu0  ;;  %v571_v32 = vpop.f32.mrb[1].mxu1  ;;  %v2559_v49 = vadd.f32 %v569_v27, %v3080_v45 }
 0x114   :  { %v2544_v31 = vadd.f32 %v500_v28, %v3073_v17  ;;  %v2560_v42 = vadd.f32 %v571_v32, %v3077_v38 }
 0x115   :  { %v1989_v33 = vmul.f32 -1.442695, %v2543_v24 }
 0x116   :  { %v1990_v37 = vmul.f32 -1.442695, %v2544_v31  ;;  %v1991_v46 = vmul.f32 -1.442695, %v2560_v42 }
 0x117   :  { %2615 = vpow2.f32 %v1989_v33 }
 0x118   :  { %2617 = vpow2.f32 %v1990_v37 }
 0x119   :  { %2619 = vpow2.f32 %v1991_v46 }
 0x11a   :  { %2621 = vtanh.f32 %v2559_v49 }
 0x121   :  { %v2616_v50 = vpop.eup %2615 }
 0x122   :  { %v2618_v52 = vpop.eup %2617  ;;  %v581_v54 = vadd.f32 1.0, %v2616_v50 }
 0x123   :  { %v587_v56 = vadd.f32 1.0, %v2618_v52  ;;  %v2620_v58 = vpop.eup %2619 }
 0x124   :  { %2623 = vrcp.f32 %v581_v54  ;;  %v2622_v60 = vpop.eup %2621  ;;  %v594_v10 = vadd.f32 1.0, %v2620_v58 }
 0x125   :  { %2625 = vrcp.f32 %v587_v56 }
 0x126   :  { %2627 = vrcp.f32 %v594_v10 }
 0x12e   :  { %v2624_v63 = vpop.eup %2623 }
 0x12f   :  { %v2626_v0 = vpop.eup %2625  ;;  %v598_v4 = vmul.f32 %v2624_v63, %v2622_v60 }
 0x130   :  { %v597_v11 = vmul.f32 0.0, %v2626_v0  ;;  %v2628_v14 = vpop.eup %2627 }
 0x132   :  { %v3083_v13 = vadd.f32 %v598_v4, %v597_v11 }
 0x134   :  { %2629 = vtanh.f32 %v3083_v13 }
 0x13e   :  { %v2630_v19 = vpop.eup %2629 }
 0x13f   :  { %v601_v24 = vmul.f32 %v2630_v19, %v2628_v14 }
 0x141   :  { %698 = vmatmul.mubr.f32.vlgmr.msra.gmra.mrb[2].mxu0 %v601_v24  ;;  %769 = vmatmul.mubr.f32.vlgmr.msra.gmra.mrb[2].mxu1 %v601_v24  ;;  %v608_v27 = vmul.f32 %v3089_v21, %v601_v24 }
 0x142   :  { %2162 = vmatpush1.bf16.msra.mxu0 %v2884_v23  ;;  %2194 = vmatpush1.bf16.msra.mxu1 %v2887_v26 }
 0x143   :  { %609 = vadd.xlane.f32.xlu0 %v608_v27  ;;  %2164 = vmatprep.subr.bf16.mxu0 %v2891_v30 }
 0x144   :  { %2196 = vmatprep.subr.bf16.mxu1 %v2898_v35  ;;  %885 = vmatprep.mubr.f32.mxu0 %v2798_v1 }
 0x145   :  { %956 = vmatprep.mubr.f32.mxu1 %v2798_v1 }
 0x146   :  { %2166 = vmatpush1.bf16.msra.mxu0 %v2900_v36  ;;  %2198 = vmatpush1.bf16.msra.mxu1 %v2904_v39 }
 0x147   :  { %2168 = vmatprep.subr.bf16.mxu0 %v2908_v43  ;;  %2200 = vmatprep.subr.bf16.mxu1 %v2915_v48 }
 0x14a   :  { %2170 = vmatpush1.bf16.msra.mxu0 %v2919_v51  ;;  %2202 = vmatpush1.bf16.msra.mxu1 %v2923_v55 }
 0x14b   :  { %2172 = vmatprep.subr.bf16.mxu0 %v2927_v59  ;;  %2204 = vmatprep.subr.bf16.mxu1 %v2931_v62 }
 0x14e   :  { %2174 = vmatpush1.bf16.msra.mxu0 %v2938_v3  ;;  %2206 = vmatpush1.bf16.msra.mxu1 %v2942_v6 }
 0x14f   :  { %2176 = vmatprep.subr.bf16.mxu0 %v2946_v9  ;;  %2208 = vmatprep.subr.bf16.mxu1 %v2950_v12 }
 0x152   :  { %2178 = vmatpush1.bf16.msra.mxu0 %v2957_v16  ;;  %2210 = vmatpush1.bf16.msra.mxu1 %v2961_v20 }
 0x153   :  { %2180 = vmatprep.subr.bf16.mxu0 %v2965_v25  ;;  %2212 = vmatprep.subr.bf16.mxu1 %v2969_v29 }
 0x156   :  { %2182 = vmatpush1.bf16.msra.mxu0 %v2976_v34  ;;  %2214 = vmatpush1.bf16.msra.mxu1 %v2980_v40 }
 0x157   :  { %2184 = vmatprep.subr.bf16.mxu0 %v2984_v44  ;;  %2216 = vmatprep.subr.bf16.mxu1 %v2988_v47 }
 0x15a   :  { %2186 = vmatpush1.bf16.msra.mxu0 %v2995_v53  ;;  %2218 = vmatpush1.bf16.msra.mxu1 %v2999_v57 }
 0x15b   :  { %2188 = vmatprep.subr.bf16.mxu0 %v3003_v61  ;;  %2220 = vmatprep.subr.bf16.mxu1 %v3007_v2 }
 0x15e   :  { %2190 = vmatpush1.bf16.msra.mxu0 %v3014_v5  ;;  %2222 = vmatpush1.bf16.msra.mxu1 %v3018_v7 }
 0x15f   :  { %2224 = vmatprep.subr.bf16.mxu0 %v2880_v18  ;;  %2256 = vmatprep.subr.bf16.mxu1 %v2882_v22 }
 0x214   :  { %v699_v28 = vpop.f32.mrb[2].mxu0  ;;  %v770_v31 = vpop.f32.mrb[2].mxu1 }
 0x215   :  { %v2545_v32 = vadd.f32 %v699_v28, %v3071_v15  ;;  %v701_v33 = vpop.f32.mrb[3].mxu0  ;;  %v772_v37 = vpop.f32.mrb[3].mxu1  ;;  %v2561_v52 = vadd.f32 %v770_v31, %v3080_v45 }
 0x216   :  { %v2546_v41 = vadd.f32 %v701_v33, %v3073_v17  ;;  %v2562_v49 = vadd.f32 %v772_v37, %v3077_v38 }
 0x217   :  { %v1995_v42 = vmul.f32 -1.442695, %v2545_v32 }
 0x218   :  { %v1996_v46 = vmul.f32 -1.442695, %v2546_v41  ;;  %v1997_v50 = vmul.f32 -1.442695, %v2562_v49 }
 0x219   :  { %2631 = vpow2.f32 %v1995_v42 }
 0x21a   :  { %2633 = vpow2.f32 %v1996_v46 }
 0x21b   :  { %2635 = vpow2.f32 %v1997_v50 }
 0x21c   :  { %2637 = vtanh.f32 %v2561_v52 }
 0x223   :  { %v2632_v54 = vpop.eup %2631 }
 0x224   :  { %v2634_v56 = vpop.eup %2633  ;;  %v782_v58 = vadd.f32 1.0, %v2632_v54 }
 0x225   :  { %v788_v60 = vadd.f32 1.0, %v2634_v56  ;;  %v2636_v63 = vpop.eup %2635 }
 0x226   :  { %2639 = vrcp.f32 %v782_v58  ;;  %v2638_v0 = vpop.eup %2637  ;;  %v795_v14 = vadd.f32 1.0, %v2636_v63 }
 0x227   :  { %2641 = vrcp.f32 %v788_v60 }
 0x228   :  { %2643 = vrcp.f32 %v795_v14 }
 0x230   :  { %v2640_v4 = vpop.eup %2639 }
 0x231   :  { %v2642_v10 = vpop.eup %2641  ;;  %v799_v11 = vmul.f32 %v2640_v4, %v2638_v0 }
 0x232   :  { %v798_v19 = vmul.f32 %v2642_v10, %v3083_v13  ;;  %v2644_v27 = vpop.eup %2643 }
 0x234   :  { %v3131_v24 = vadd.f32 %v799_v11, %v798_v19 }
 0x236   :  { %2645 = vtanh.f32 %v3131_v24 }
 0x240   :  { %v2646_v28 = vpop.eup %2645 }
 0x241   :  { %v802_v31 = vmul.f32 %v2646_v28, %v2644_v27 }
 0x243   :  { %886 = vmatmul.mubr.f32.vlgmr.msra.gmra.mrb[4].mxu0 %v802_v31  ;;  %957 = vmatmul.mubr.f32.vlgmr.msra.gmra.mrb[4].mxu1 %v802_v31  ;;  %v803_v32 = vmul.f32 %v3089_v21, %v802_v31 }
 0x244   :  { %2226 = vmatpush1.bf16.msra.mxu0 %v2884_v23  ;;  %2258 = vmatpush1.bf16.msra.mxu1 %v2887_v26 }
 0x245   :  { %804 = vadd.xlane.f32.xlu0 %v803_v32  ;;  %2228 = vmatprep.subr.bf16.mxu0 %v2891_v30 }
 0x246   :  { %2260 = vmatprep.subr.bf16.mxu1 %v2898_v35  ;;  %1073 = vmatprep.mubr.f32.mxu0 %v2798_v1 }
 0x247   :  { %1144 = vmatprep.mubr.f32.mxu1 %v2798_v1 }
 0x248   :  { %2230 = vmatpush1.bf16.msra.mxu0 %v2900_v36  ;;  %2262 = vmatpush1.bf16.msra.mxu1 %v2904_v39 }
 0x249   :  { %2232 = vmatprep.subr.bf16.mxu0 %v2908_v43  ;;  %2264 = vmatprep.subr.bf16.mxu1 %v2915_v48 }
 0x24c   :  { %2234 = vmatpush1.bf16.msra.mxu0 %v2919_v51  ;;  %2266 = vmatpush1.bf16.msra.mxu1 %v2923_v55 }
 0x24d   :  { %2236 = vmatprep.subr.bf16.mxu0 %v2927_v59  ;;  %2268 = vmatprep.subr.bf16.mxu1 %v2931_v62 }
 0x250   :  { %2238 = vmatpush1.bf16.msra.mxu0 %v2938_v3  ;;  %2270 = vmatpush1.bf16.msra.mxu1 %v2942_v6 }
 0x251   :  { %2240 = vmatprep.subr.bf16.mxu0 %v2946_v9  ;;  %2272 = vmatprep.subr.bf16.mxu1 %v2950_v12 }
 0x254   :  { %2242 = vmatpush1.bf16.msra.mxu0 %v2957_v16  ;;  %2274 = vmatpush1.bf16.msra.mxu1 %v2961_v20 }
 0x255   :  { %2244 = vmatprep.subr.bf16.mxu0 %v2965_v25  ;;  %2276 = vmatprep.subr.bf16.mxu1 %v2969_v29 }
 0x258   :  { %2246 = vmatpush1.bf16.msra.mxu0 %v2976_v34  ;;  %2278 = vmatpush1.bf16.msra.mxu1 %v2980_v40 }
 0x259   :  { %2248 = vmatprep.subr.bf16.mxu0 %v2984_v44  ;;  %2280 = vmatprep.subr.bf16.mxu1 %v2988_v47 }
 0x25c   :  { %2250 = vmatpush1.bf16.msra.mxu0 %v2995_v53  ;;  %2282 = vmatpush1.bf16.msra.mxu1 %v2999_v57 }
 0x25d   :  { %2252 = vmatprep.subr.bf16.mxu0 %v3003_v61  ;;  %2284 = vmatprep.subr.bf16.mxu1 %v3007_v2 }
 0x260   :  { %2254 = vmatpush1.bf16.msra.mxu0 %v3014_v5  ;;  %2286 = vmatpush1.bf16.msra.mxu1 %v3018_v7 }
 0x261   :  { %2288 = vmatprep.subr.bf16.mxu0 %v2880_v18  ;;  %2320 = vmatprep.subr.bf16.mxu1 %v2882_v22 }
 0x316   :  { %v887_v13 = vpop.f32.mrb[4].mxu0  ;;  %v958_v33 = vpop.f32.mrb[4].mxu1 }
 0x317   :  { %v2547_v37 = vadd.f32 %v887_v13, %v3071_v15  ;;  %v889_v41 = vpop.f32.mrb[5].mxu0  ;;  %v960_v42 = vpop.f32.mrb[5].mxu1  ;;  %v2563_v56 = vadd.f32 %v958_v33, %v3080_v45 }
 0x318   :  { %v2548_v46 = vadd.f32 %v889_v41, %v3073_v17  ;;  %v2564_v52 = vadd.f32 %v960_v42, %v3077_v38 }
 0x319   :  { %v1999_v49 = vmul.f32 -1.442695, %v2547_v37 }
 0x31a   :  { %v2000_v50 = vmul.f32 -1.442695, %v2548_v46  ;;  %v2001_v54 = vmul.f32 -1.442695, %v2564_v52 }
 0x31b   :  { %2647 = vpow2.f32 %v1999_v49 }
 0x31c   :  { %2649 = vpow2.f32 %v2000_v50 }
 0x31d   :  { %2651 = vpow2.f32 %v2001_v54 }
 0x31e   :  { %2653 = vtanh.f32 %v2563_v56 }
 0x325   :  { %v2648_v58 = vpop.eup %2647 }
 0x326   :  { %v2650_v60 = vpop.eup %2649  ;;  %v970_v63 = vadd.f32 1.0, %v2648_v58 }
 0x327   :  { %v976_v0 = vadd.f32 1.0, %v2650_v60  ;;  %v2652_v4 = vpop.eup %2651 }
 0x328   :  { %2655 = vrcp.f32 %v970_v63  ;;  %v2654_v10 = vpop.eup %2653  ;;  %v983_v27 = vadd.f32 1.0, %v2652_v4 }
 0x329   :  { %2657 = vrcp.f32 %v976_v0 }
 0x32a   :  { %2659 = vrcp.f32 %v983_v27 }
 0x332   :  { %v2656_v11 = vpop.eup %2655 }
 0x333   :  { %v2658_v14 = vpop.eup %2657  ;;  %v987_v19 = vmul.f32 %v2656_v11, %v2654_v10 }
 0x334   :  { %v986_v28 = vmul.f32 %v2658_v14, %v3131_v24  ;;  %v2660_v32 = vpop.eup %2659 }
 0x336   :  { %v3174_v31 = vadd.f32 %v987_v19, %v986_v28 }
 0x338   :  { %2661 = vtanh.f32 %v3174_v31 }
 0x342   :  { %v2662_v13 = vpop.eup %2661 }
 0x343   :  { %v990_v33 = vmul.f32 %v2662_v13, %v2660_v32 }
 0x345   :  { %1074 = vmatmul.mubr.f32.vlgmr.msra.gmra.mrb[6].mxu0 %v990_v33  ;;  %1145 = vmatmul.mubr.f32.vlgmr.msra.gmra.mrb[6].mxu1 %v990_v33  ;;  %v991_v37 = vmul.f32 %v3089_v21, %v990_v33 }
 0x346   :  { %2290 = vmatpush1.bf16.msra.mxu0 %v2884_v23  ;;  %2322 = vmatpush1.bf16.msra.mxu1 %v2887_v26 }
 0x347   :  { %992 = vadd.xlane.f32.xlu1 %v991_v37  ;;  %2292 = vmatprep.subr.bf16.mxu0 %v2891_v30 }
 0x348   :  { %2324 = vmatprep.subr.bf16.mxu1 %v2898_v35  ;;  %1261 = vmatprep.mubr.f32.mxu0 %v2798_v1 }
 0x349   :  { %1332 = vmatprep.mubr.f32.mxu1 %v2798_v1 }
 0x34a   :  { %2294 = vmatpush1.bf16.msra.mxu0 %v2900_v36  ;;  %2326 = vmatpush1.bf16.msra.mxu1 %v2904_v39 }
 0x34b   :  { %2296 = vmatprep.subr.bf16.mxu0 %v2908_v43  ;;  %2328 = vmatprep.subr.bf16.mxu1 %v2915_v48 }
 0x34e   :  { %2298 = vmatpush1.bf16.msra.mxu0 %v2919_v51  ;;  %2330 = vmatpush1.bf16.msra.mxu1 %v2923_v55 }
 0x34f   :  { %2300 = vmatprep.subr.bf16.mxu0 %v2927_v59  ;;  %2332 = vmatprep.subr.bf16.mxu1 %v2931_v62 }
 0x352   :  { %2302 = vmatpush1.bf16.msra.mxu0 %v2938_v3  ;;  %2334 = vmatpush1.bf16.msra.mxu1 %v2942_v6 }
 0x353   :  { %2304 = vmatprep.subr.bf16.mxu0 %v2946_v9  ;;  %2336 = vmatprep.subr.bf16.mxu1 %v2950_v12 }
 0x356   :  { %2306 = vmatpush1.bf16.msra.mxu0 %v2957_v16  ;;  %2338 = vmatpush1.bf16.msra.mxu1 %v2961_v20 }
 0x357   :  { %2308 = vmatprep.subr.bf16.mxu0 %v2965_v25  ;;  %2340 = vmatprep.subr.bf16.mxu1 %v2969_v29 }
 0x35a   :  { %2310 = vmatpush1.bf16.msra.mxu0 %v2976_v34  ;;  %2342 = vmatpush1.bf16.msra.mxu1 %v2980_v40 }
 0x35b   :  { %2312 = vmatprep.subr.bf16.mxu0 %v2984_v44  ;;  %2344 = vmatprep.subr.bf16.mxu1 %v2988_v47 }
 0x35e   :  { %2314 = vmatpush1.bf16.msra.mxu0 %v2995_v53  ;;  %2346 = vmatpush1.bf16.msra.mxu1 %v2999_v57 }
 0x35f   :  { %2316 = vmatprep.subr.bf16.mxu0 %v3003_v61  ;;  %2348 = vmatprep.subr.bf16.mxu1 %v3007_v2 }
 0x362   :  { %2318 = vmatpush1.bf16.msra.mxu0 %v3014_v5  ;;  %2350 = vmatpush1.bf16.msra.mxu1 %v3018_v7 }
 0x363   :  { %2352 = vmatprep.subr.bf16.mxu0 %v2880_v18  ;;  %2384 = vmatprep.subr.bf16.mxu1 %v2882_v22 }
 0x418   :  { %v1075_v24 = vpop.f32.mrb[6].mxu0  ;;  %v1146_v41 = vpop.f32.mrb[6].mxu1 }
 0x419   :  { %v2549_v42 = vadd.f32 %v1075_v24, %v3071_v15  ;;  %v1077_v46 = vpop.f32.mrb[7].mxu0  ;;  %v1148_v49 = vpop.f32.mrb[7].mxu1  ;;  %v2565_v60 = vadd.f32 %v1146_v41, %v3080_v45 }
 0x41a   :  { %v2550_v50 = vadd.f32 %v1077_v46, %v3073_v17  ;;  %v2566_v56 = vadd.f32 %v1148_v49, %v3077_v38 }
 0x41b   :  { %v2003_v52 = vmul.f32 -1.442695, %v2549_v42 }
 0x41c   :  { %v2004_v54 = vmul.f32 -1.442695, %v2550_v50  ;;  %v2005_v58 = vmul.f32 -1.442695, %v2566_v56 }
 0x41d   :  { %2663 = vpow2.f32 %v2003_v52 }
 0x41e   :  { %2665 = vpow2.f32 %v2004_v54 }
 0x41f   :  { %2667 = vpow2.f32 %v2005_v58 }
 0x420   :  { %2669 = vtanh.f32 %v2565_v60 }
 0x427   :  { %v2664_v63 = vpop.eup %2663 }
 0x428   :  { %v2666_v0 = vpop.eup %2665  ;;  %v1158_v4 = vadd.f32 1.0, %v2664_v63 }
 0x429   :  { %v1164_v10 = vadd.f32 1.0, %v2666_v0  ;;  %v2668_v11 = vpop.eup %2667 }
 0x42a   :  { %2671 = vrcp.f32 %v1158_v4  ;;  %v2670_v14 = vpop.eup %2669  ;;  %v1171_v32 = vadd.f32 1.0, %v2668_v11 }
 0x42b   :  { %2673 = vrcp.f32 %v1164_v10 }
 0x42c   :  { %2675 = vrcp.f32 %v1171_v32 }
 0x434   :  { %v2672_v19 = vpop.eup %2671 }
 0x435   :  { %v2674_v27 = vpop.eup %2673  ;;  %v1175_v28 = vmul.f32 %v2672_v19, %v2670_v14 }
 0x436   :  { %v1174_v13 = vmul.f32 %v2674_v27, %v3174_v31  ;;  %v2676_v37 = vpop.eup %2675 }
 0x438   :  { %v3217_v33 = vadd.f32 %v1175_v28, %v1174_v13 }
 0x43a   :  { %2677 = vtanh.f32 %v3217_v33 }
 0x444   :  { %v2678_v24 = vpop.eup %2677 }
 0x445   :  { %v1178_v41 = vmul.f32 %v2678_v24, %v2676_v37 }
 0x447   :  { %1262 = vmatmul.mubr.f32.vlgmr.msra.gmra.mrb[8].mxu0 %v1178_v41  ;;  %1333 = vmatmul.mubr.f32.vlgmr.msra.gmra.mrb[8].mxu1 %v1178_v41  ;;  %v1179_v42 = vmul.f32 %v3089_v21, %v1178_v41 }
 0x448   :  { %2354 = vmatpush1.bf16.msra.mxu0 %v2884_v23  ;;  %2386 = vmatpush1.bf16.msra.mxu1 %v2887_v26 }
 0x449   :  { %1180 = vadd.xlane.f32.xlu1 %v1179_v42  ;;  %2356 = vmatprep.subr.bf16.mxu0 %v2891_v30 }
 0x44a   :  { %2388 = vmatprep.subr.bf16.mxu1 %v2898_v35  ;;  %1449 = vmatprep.mubr.f32.mxu0 %v2798_v1 }
 0x44b   :  { %1520 = vmatprep.mubr.f32.mxu1 %v2798_v1 }
 0x44c   :  { %2358 = vmatpush1.bf16.msra.mxu0 %v2900_v36  ;;  %2390 = vmatpush1.bf16.msra.mxu1 %v2904_v39 }
 0x44d   :  { %2360 = vmatprep.subr.bf16.mxu0 %v2908_v43  ;;  %2392 = vmatprep.subr.bf16.mxu1 %v2915_v48 }
 0x450   :  { %2362 = vmatpush1.bf16.msra.mxu0 %v2919_v51  ;;  %2394 = vmatpush1.bf16.msra.mxu1 %v2923_v55 }
 0x451   :  { %2364 = vmatprep.subr.bf16.mxu0 %v2927_v59  ;;  %2396 = vmatprep.subr.bf16.mxu1 %v2931_v62 }
 0x454   :  { %2366 = vmatpush1.bf16.msra.mxu0 %v2938_v3  ;;  %2398 = vmatpush1.bf16.msra.mxu1 %v2942_v6 }
 0x455   :  { %2368 = vmatprep.subr.bf16.mxu0 %v2946_v9  ;;  %2400 = vmatprep.subr.bf16.mxu1 %v2950_v12 }
 0x458   :  { %2370 = vmatpush1.bf16.msra.mxu0 %v2957_v16  ;;  %2402 = vmatpush1.bf16.msra.mxu1 %v2961_v20 }
 0x459   :  { %2372 = vmatprep.subr.bf16.mxu0 %v2965_v25  ;;  %2404 = vmatprep.subr.bf16.mxu1 %v2969_v29 }
 0x45c   :  { %2374 = vmatpush1.bf16.msra.mxu0 %v2976_v34  ;;  %2406 = vmatpush1.bf16.msra.mxu1 %v2980_v40 }
 0x45d   :  { %2376 = vmatprep.subr.bf16.mxu0 %v2984_v44  ;;  %2408 = vmatprep.subr.bf16.mxu1 %v2988_v47 }
 0x460   :  { %2378 = vmatpush1.bf16.msra.mxu0 %v2995_v53  ;;  %2410 = vmatpush1.bf16.msra.mxu1 %v2999_v57 }
 0x461   :  { %2380 = vmatprep.subr.bf16.mxu0 %v3003_v61  ;;  %2412 = vmatprep.subr.bf16.mxu1 %v3007_v2 }
 0x464   :  { %2382 = vmatpush1.bf16.msra.mxu0 %v3014_v5  ;;  %2414 = vmatpush1.bf16.msra.mxu1 %v3018_v7 }
 0x465   :  { %2416 = vmatprep.subr.bf16.mxu0 %v2880_v18  ;;  %2448 = vmatprep.subr.bf16.mxu1 %v2882_v22 }
 0x51a   :  { %v1263_v31 = vpop.f32.mrb[8].mxu0  ;;  %v1334_v46 = vpop.f32.mrb[8].mxu1 }
 0x51b   :  { %v2551_v49 = vadd.f32 %v1263_v31, %v3071_v15  ;;  %v1265_v50 = vpop.f32.mrb[9].mxu0  ;;  %v1336_v52 = vpop.f32.mrb[9].mxu1  ;;  %v2567_v0 = vadd.f32 %v1334_v46, %v3080_v45 }
 0x51c   :  { %v2552_v54 = vadd.f32 %v1265_v50, %v3073_v17  ;;  %v2568_v60 = vadd.f32 %v1336_v52, %v3077_v38 }
 0x51d   :  { %v2007_v56 = vmul.f32 -1.442695, %v2551_v49 }
 0x51e   :  { %v2008_v58 = vmul.f32 -1.442695, %v2552_v54  ;;  %v2009_v63 = vmul.f32 -1.442695, %v2568_v60 }
 0x51f   :  { %2679 = vpow2.f32 %v2007_v56 }
 0x520   :  { %2681 = vpow2.f32 %v2008_v58 }
 0x521   :  { %2683 = vpow2.f32 %v2009_v63 }
 0x522   :  { %2685 = vtanh.f32 %v2567_v0 }
 0x529   :  { %v2680_v4 = vpop.eup %2679 }
 0x52a   :  { %v2682_v10 = vpop.eup %2681  ;;  %v1346_v11 = vadd.f32 1.0, %v2680_v4 }
 0x52b   :  { %v1352_v14 = vadd.f32 1.0, %v2682_v10  ;;  %v2684_v19 = vpop.eup %2683 }
 0x52c   :  { %2687 = vrcp.f32 %v1346_v11  ;;  %v2686_v27 = vpop.eup %2685  ;;  %v1359_v37 = vadd.f32 1.0, %v2684_v19 }
 0x52d   :  { %2689 = vrcp.f32 %v1352_v14 }
 0x52e   :  { %2691 = vrcp.f32 %v1359_v37 }
 0x536   :  { %v2688_v28 = vpop.eup %2687 }
 0x537   :  { %v2690_v32 = vpop.eup %2689  ;;  %v1363_v13 = vmul.f32 %v2688_v28, %v2686_v27 }
 0x538   :  { %v1362_v24 = vmul.f32 %v2690_v32, %v3217_v33  ;;  %v2692_v42 = vpop.eup %2691 }
 0x53a   :  { %v3260_v41 = vadd.f32 %v1363_v13, %v1362_v24 }
 0x53c   :  { %2693 = vtanh.f32 %v3260_v41 }
 0x546   :  { %v2694_v31 = vpop.eup %2693 }
 0x547   :  { %v1366_v46 = vmul.f32 %v2694_v31, %v2692_v42 }
 0x549   :  { %1450 = vmatmul.mubr.f32.vlgmr.msra.gmra.mrb[10].mxu0 %v1366_v46  ;;  %1521 = vmatmul.mubr.f32.vlgmr.msra.gmra.mrb[10].mxu1 %v1366_v46  ;;  %v1367_v49 = vmul.f32 %v3089_v21, %v1366_v46 }
 0x54a   :  { %2418 = vmatpush1.bf16.msra.mxu0 %v2884_v23  ;;  %2450 = vmatpush1.bf16.msra.mxu1 %v2887_v26 }
 0x54b   :  { %1368 = vadd.xlane.f32.xlu0 %v1367_v49  ;;  %2420 = vmatprep.subr.bf16.mxu0 %v2891_v30 }
 0x54c   :  { %2452 = vmatprep.subr.bf16.mxu1 %v2898_v35  ;;  %1637 = vmatprep.mubr.f32.mxu0 %v2798_v1 }
 0x54d   :  { %1708 = vmatprep.mubr.f32.mxu1 %v2798_v1 }
 0x54e   :  { %2422 = vmatpush1.bf16.msra.mxu0 %v2900_v36  ;;  %2454 = vmatpush1.bf16.msra.mxu1 %v2904_v39 }
 0x54f   :  { %2424 = vmatprep.subr.bf16.mxu0 %v2908_v43  ;;  %2456 = vmatprep.subr.bf16.mxu1 %v2915_v48 }
 0x552   :  { %2426 = vmatpush1.bf16.msra.mxu0 %v2919_v51  ;;  %2458 = vmatpush1.bf16.msra.mxu1 %v2923_v55 }
 0x553   :  { %2428 = vmatprep.subr.bf16.mxu0 %v2927_v59  ;;  %2460 = vmatprep.subr.bf16.mxu1 %v2931_v62 }
 0x556   :  { %2430 = vmatpush1.bf16.msra.mxu0 %v2938_v3  ;;  %2462 = vmatpush1.bf16.msra.mxu1 %v2942_v6 }
 0x557   :  { %2432 = vmatprep.subr.bf16.mxu0 %v2946_v9  ;;  %2464 = vmatprep.subr.bf16.mxu1 %v2950_v12 }
 0x55a   :  { %2434 = vmatpush1.bf16.msra.mxu0 %v2957_v16  ;;  %2466 = vmatpush1.bf16.msra.mxu1 %v2961_v20 }
 0x55b   :  { %2436 = vmatprep.subr.bf16.mxu0 %v2965_v25  ;;  %2468 = vmatprep.subr.bf16.mxu1 %v2969_v29 }
 0x55e   :  { %2438 = vmatpush1.bf16.msra.mxu0 %v2976_v34  ;;  %2470 = vmatpush1.bf16.msra.mxu1 %v2980_v40 }
 0x55f   :  { %2440 = vmatprep.subr.bf16.mxu0 %v2984_v44  ;;  %2472 = vmatprep.subr.bf16.mxu1 %v2988_v47 }
 0x562   :  { %2442 = vmatpush1.bf16.msra.mxu0 %v2995_v53  ;;  %2474 = vmatpush1.bf16.msra.mxu1 %v2999_v57 }
 0x563   :  { %2444 = vmatprep.subr.bf16.mxu0 %v3003_v61  ;;  %2476 = vmatprep.subr.bf16.mxu1 %v3007_v2 }
 0x566   :  { %2446 = vmatpush1.bf16.msra.mxu0 %v3014_v5  ;;  %2478 = vmatpush1.bf16.msra.mxu1 %v3018_v7 }
 0x567   :  { %2480 = vmatprep.subr.bf16.mxu0 %v2880_v18  ;;  %2512 = vmatprep.subr.bf16.mxu1 %v2882_v22 }
 0x61c   :  { %v1451_v33 = vpop.f32.mrb[10].mxu0  ;;  %v1522_v50 = vpop.f32.mrb[10].mxu1 }
 0x61d   :  { %v2553_v52 = vadd.f32 %v1451_v33, %v3071_v15  ;;  %v1453_v54 = vpop.f32.mrb[11].mxu0  ;;  %v1524_v56 = vpop.f32.mrb[11].mxu1  ;;  %v2569_v10 = vadd.f32 %v1522_v50, %v3080_v45 }
 0x61e   :  { %v2554_v58 = vadd.f32 %v1453_v54, %v3073_v17  ;;  %v2570_v0 = vadd.f32 %v1524_v56, %v3077_v38 }
 0x61f   :  { %v2011_v60 = vmul.f32 -1.442695, %v2553_v52 }
 0x620   :  { %v2012_v63 = vmul.f32 -1.442695, %v2554_v58  ;;  %v2013_v4 = vmul.f32 -1.442695, %v2570_v0 }
 0x621   :  { %2695 = vpow2.f32 %v2011_v60 }
 0x622   :  { %2697 = vpow2.f32 %v2012_v63 }
 0x623   :  { %2699 = vpow2.f32 %v2013_v4 }
 0x624   :  { %2701 = vtanh.f32 %v2569_v10 }
 0x62b   :  { %v2696_v18 = vpop.eup %2695 }
 0x62c   :  { %v2698_v11 = vpop.eup %2697  ;;  %v1534_v22 = vadd.f32 1.0, %v2696_v18 }
 0x62d   :  { %v1540_v14 = vadd.f32 1.0, %v2698_v11  ;;  %v2700_v19 = vpop.eup %2699 }
 0x62e   :  { %2703 = vrcp.f32 %v1534_v22  ;;  %v2702_v27 = vpop.eup %2701  ;;  %v1547_v37 = vadd.f32 1.0, %v2700_v19 }
 0x62f   :  { %2705 = vrcp.f32 %v1540_v14 }
 0x630   :  { %2707 = vrcp.f32 %v1547_v37 }
 0x638   :  { %v2704_v28 = vpop.eup %2703 }
 0x639   :  { %v2706_v32 = vpop.eup %2705  ;;  %v1551_v13 = vmul.f32 %v2704_v28, %v2702_v27 }
 0x63a   :  { %v1550_v24 = vmul.f32 %v2706_v32, %v3260_v41  ;;  %v2708_v31 = vpop.eup %2707 }
 0x63c   :  { %v3303_v42 = vadd.f32 %v1551_v13, %v1550_v24 }
 0x63e   :  { %2709 = vtanh.f32 %v3303_v42 }
 0x648   :  { %v2710_v46 = vpop.eup %2709 }
 0x649   :  { %v1554_v49 = vmul.f32 %v2710_v46, %v2708_v31 }
 0x64b   :  { %1638 = vmatmul.mubr.f32.vlgmr.msra.gmra.mrb[12].mxu0 %v1554_v49  ;;  %1709 = vmatmul.mubr.f32.vlgmr.msra.gmra.mrb[12].mxu1 %v1554_v49  ;;  %v1555_v33 = vmul.f32 %v3089_v21, %v1554_v49 }
 0x64c   :  { %2482 = vmatpush1.bf16.msra.mxu0 %v2884_v23  ;;  %2514 = vmatpush1.bf16.msra.mxu1 %v2887_v26  ;;  %v2799_v23 = vmov 0  }
 0x64d   :  { %1556 = vadd.xlane.f32.xlu1 %v1555_v33  ;;  %2484 = vmatprep.subr.bf16.mxu0 %v2891_v30  ;;  %v993_v33 = vpop.xlane.xlu1 %992 }
 0x64e   :  { %2516 = vmatprep.subr.bf16.mxu1 %v2898_v35  ;;  %1825 = vmatprep.mubr.f32.mxu0 %v2798_v1 }
 0x64f   :  { %1896 = vmatprep.mubr.f32.mxu1 %v2798_v1  ;;  %2613 = vset.pattern.permute.xlu0 %v2799_v23 }
 0x650   :  { %2486 = vmatpush1.bf16.msra.mxu0 %v2900_v36  ;;  %2518 = vmatpush1.bf16.msra.mxu1 %v2904_v39 }
 0x651   :  { %2488 = vmatprep.subr.bf16.mxu0 %v2908_v43  ;;  %2520 = vmatprep.subr.bf16.mxu1 %v2915_v48 }
 0x652   :  { %2614 = vset.pattern.permute.xlu1 %v2799_v23 }
 0x654   :  { %2490 = vmatpush1.bf16.msra.mxu0 %v2919_v51  ;;  %2522 = vmatpush1.bf16.msra.mxu1 %v2923_v55 }
 0x655   :  { %2492 = vmatprep.subr.bf16.mxu0 %v2927_v59  ;;  %2524 = vmatprep.subr.bf16.mxu1 %v2931_v62 }
 0x658   :  { %2494 = vmatpush1.bf16.msra.mxu0 %v2938_v3  ;;  %2526 = vmatpush1.bf16.msra.mxu1 %v2942_v6 }
 0x659   :  { %2496 = vmatprep.subr.bf16.mxu0 %v2946_v9  ;;  %2528 = vmatprep.subr.bf16.mxu1 %v2950_v12 }
 0x65c   :  { %2498 = vmatpush1.bf16.msra.mxu0 %v2957_v16  ;;  %2530 = vmatpush1.bf16.msra.mxu1 %v2961_v20 }
 0x65d   :  { %2500 = vmatprep.subr.bf16.mxu0 %v2965_v25  ;;  %2532 = vmatprep.subr.bf16.mxu1 %v2969_v29 }
 0x660   :  { %2502 = vmatpush1.bf16.msra.mxu0 %v2976_v34  ;;  %2534 = vmatpush1.bf16.msra.mxu1 %v2980_v40 }
 0x661   :  { %2504 = vmatprep.subr.bf16.mxu0 %v2984_v44  ;;  %2536 = vmatprep.subr.bf16.mxu1 %v2988_v47 }
 0x664   :  { %2506 = vmatpush1.bf16.msra.mxu0 %v2995_v53  ;;  %2538 = vmatpush1.bf16.msra.mxu1 %v2999_v57 }
 0x665   :  { %2508 = vmatprep.subr.bf16.mxu0 %v3003_v61  ;;  %2540 = vmatprep.subr.bf16.mxu1 %v3007_v2 }
 0x668   :  { %2510 = vmatpush1.bf16.msra.mxu0 %v3014_v5  ;;  %2542 = vmatpush1.bf16.msra.mxu1 %v3018_v7  ;;  %v1993_v5 = vld [vmem:[#allocation3] ss:$0 sm:$0xff]  ;;  %v610_v7 = vpop.xlane.xlu0 %609 }
 0x669   :  { %v618_v41 = vadd.f32 %v1993_v5, %v610_v7  ;;  %v994_v23 = vadd.f32 %v1993_v5, %v993_v33 }
 0x66c   :  { %v805_v46 = vpop.xlane.xlu0 %804 }
 0x66d   :  { %v806_v49 = vadd.f32 %v1993_v5, %v805_v46 }
 0x71e   :  { %v1639_v26 = vpop.f32.mrb[12].mxu0  ;;  %v1710_v30 = vpop.f32.mrb[12].mxu1 }
 0x71f   :  { %v2555_v35 = vadd.f32 %v1639_v26, %v3071_v15  ;;  %v1641_v36 = vpop.f32.mrb[13].mxu0  ;;  %v1712_v39 = vpop.f32.mrb[13].mxu1  ;;  %v2571_v62 = vadd.f32 %v1710_v30, %v3080_v45 }
 0x720   :  { %v2556_v43 = vadd.f32 %v1641_v36, %v3073_v17  ;;  %v2572_v55 = vadd.f32 %v1712_v39, %v3077_v38  ;;  %v1181_v26 = vpop.xlane.xlu1 %1180 }
 0x721   :  { %v2015_v48 = vmul.f32 -1.442695, %v2555_v35  ;;  %v1182_v30 = vadd.f32 %v1993_v5, %v1181_v26  ;;  %v1369_v35 = vpop.xlane.xlu0 %1368 }
 0x722   :  { %v2016_v51 = vmul.f32 -1.442695, %v2556_v43  ;;  %v2017_v59 = vmul.f32 -1.442695, %v2572_v55  ;;  %v1370_v36 = vadd.f32 %v1993_v5, %v1369_v35 }
 0x723   :  { %2711 = vpow2.f32 %v2015_v48 }
 0x724   :  { %2713 = vpow2.f32 %v2016_v51  ;;  %v1557_v39 = vpop.xlane.xlu1 %1556 }
 0x725   :  { %2715 = vpow2.f32 %v2017_v59  ;;  %v1558_v43 = vadd.f32 %v1993_v5, %v1557_v39 }
 0x726   :  { %2717 = vtanh.f32 %v2571_v62 }
 0x72d   :  { %v2712_v3 = vpop.eup %2711 }
 0x72e   :  { %v2714_v6 = vpop.eup %2713  ;;  %v1722_v9 = vadd.f32 1.0, %v2712_v3 }
 0x72f   :  { %v1728_v12 = vadd.f32 1.0, %v2714_v6  ;;  %v2716_v16 = vpop.eup %2715  ;;  %v363_v6 = vand.u32 127, %v58_v8 }
 0x730   :  { %2719 = vrcp.f32 %v1722_v9  ;;  %v2718_v20 = vpop.eup %2717  ;;  %v1735_v40 = vadd.f32 1.0, %v2716_v16 }
 0x731   :  { %2721 = vrcp.f32 %v1728_v12  ;;  %vm807_vm1 = vcmp.eq.s32.totalorder %v363_v6, 1  ;;  %vm619_vm2 = vcmp.eq.s32.totalorder %v363_v6, 0  ;;  %vm995_vm3 = vcmp.eq.s32.totalorder %v363_v6, 2 }
 0x732   :  { %2723 = vrcp.f32 %v1735_v40  ;;  %v1998_v12 = vsel %vm807_vm1, 1.0, %v2798_v1  ;;  %vm1183_vm4 = vcmp.eq.s32.totalorder %v363_v6, 3  ;;  %v1994_v16 = vsel %vm619_vm2, 1.0, %v2798_v1 }
 0x733   :  { %vm1371_vm5 = vcmp.eq.s32.totalorder %v363_v6, 4  ;;  %vm1559_vm6 = vcmp.eq.s32.totalorder %v363_v6, 5  ;;  %vm1747_vm7 = vcmp.eq.s32.totalorder %v363_v6, 6  ;;  %vm1935_vm8 = vcmp.eq.s32.totalorder %v363_v6, 7 }
 0x734   :  { %v2010_v8 = vsel %vm1371_vm5, 1.0, %v2798_v1  ;;  %v2018_v7 = vsel %vm1747_vm7, 1.0, %v2798_v1 }
 0x73a   :  { %v2720_v25 = vpop.eup %2719 }
 0x73b   :  { %v2722_v29 = vpop.eup %2721  ;;  %v1739_v34 = vmul.f32 %v2720_v25, %v2718_v20  ;;  %v2002_v25 = vsel %vm995_vm3, 1.0, %v2798_v1 }
 0x73c   :  { %v1738_v44 = vmul.f32 %v2722_v29, %v3303_v42  ;;  %v2724_v53 = vpop.eup %2723 }
 0x73e   :  { %v1740_v47 = vadd.f32 %v1739_v34, %v1738_v44  ;;  %v2006_v34 = vsel %vm1183_vm4, 1.0, %v2798_v1 }
 0x740   :  { %2725 = vtanh.f32 %v1740_v47 }
 0x74a   :  { %v2726_v57 = vpop.eup %2725 }
 0x74b   :  { %v1742_v61 = vmul.f32 %v2726_v57, %v2724_v53 }
 0x74d   :  { %1826 = vmatmul.mubr.f32.vlgmr.msra.gmra.mrb[14].mxu0 %v1742_v61  ;;  %1897 = vmatmul.mubr.f32.vlgmr.msra.gmra.mrb[14].mxu1 %v1742_v61  ;;  %v1743_v2 = vmul.f32 %v3089_v21, %v1742_v61  ;;  %v2014_v61 = vsel %vm1559_vm6, 1.0, %v2798_v1 }
 0x74f   :  { %1744 = vadd.xlane.f32.xlu0 %v1743_v2 }
 0x765   :  { %624 = vperm.xlu0 %2613, %v618_v41  }
 0x7dc   :  { %v1745_v48 = vpop.xlane.xlu0 %1744 }
 0x7dd   :  { %v1746_v51 = vadd.f32 %v1993_v5, %v1745_v48 }
 0x7e4   :  { %v625_v20 = vpop.permute.xlu0 %624 }
 0x7e5   :  { %v627_v44 = vmul.f32 %v1994_v16, %v625_v20 }
 0x820   :  { %v1827_v50 = vpop.f32.mrb[14].mxu0  ;;  %v1898_v52 = vpop.f32.mrb[14].mxu1 }
 0x821   :  { %v2557_v54 = vadd.f32 %v1827_v50, %v3071_v15  ;;  %v1829_v56 = vpop.f32.mrb[15].mxu0  ;;  %v1900_v58 = vpop.f32.mrb[15].mxu1  ;;  %v2573_v18 = vadd.f32 %v1898_v52, %v3080_v45 }
 0x822   :  { %v2558_v60 = vadd.f32 %v1829_v56, %v3073_v17  ;;  %v2574_v4 = vadd.f32 %v1900_v58, %v3077_v38  ;;  %v2022_v58 = vsel %vm1935_vm8, 1.0, %v2798_v1 }
 0x823   :  { %v2019_v63 = vmul.f32 -1.442695, %v2557_v54 }
 0x824   :  { %v2020_v0 = vmul.f32 -1.442695, %v2558_v60  ;;  %v2021_v10 = vmul.f32 -1.442695, %v2574_v4 }
 0x825   :  { %2727 = vpow2.f32 %v2019_v63 }
 0x826   :  { %2729 = vpow2.f32 %v2020_v0 }
 0x827   :  { %2731 = vpow2.f32 %v2021_v10 }
 0x828   :  { %2733 = vtanh.f32 %v2573_v18 }
 0x82f   :  { %v2728_v11 = vpop.eup %2727 }
 0x830   :  { %v2730_v22 = vpop.eup %2729  ;;  %v1910_v14 = vadd.f32 1.0, %v2728_v11 }
 0x831   :  { %v1916_v19 = vadd.f32 1.0, %v2730_v22  ;;  %v2732_v15 = vpop.eup %2731 }
 0x832   :  { %2735 = vrcp.f32 %v1910_v14  ;;  %v2734_v27 = vpop.eup %2733  ;;  %v1923_v13 = vadd.f32 1.0, %v2732_v15 }
 0x833   :  { %2737 = vrcp.f32 %v1916_v19 }
 0x834   :  { %2739 = vrcp.f32 %v1923_v13 }
 0x83c   :  { %v2736_v17 = vpop.eup %2735 }
 0x83d   :  { %v2738_v28 = vpop.eup %2737  ;;  %v1927_v32 = vmul.f32 %v2736_v17, %v2734_v27 }
 0x83e   :  { %v1926_v37 = vmul.f32 %v2738_v28, %v1740_v47  ;;  %v2740_v38 = vpop.eup %2739 }
 0x840   :  { %v1928_v24 = vadd.f32 %v1927_v32, %v1926_v37 }
 0x842   :  { %2741 = vtanh.f32 %v1928_v24 }
 0x84c   :  { %v2742_v45 = vpop.eup %2741 }
 0x84d   :  { %v1930_v42 = vmul.f32 %v2742_v45, %v2740_v38 }
 0x84f   :  { %v1931_v31 = vmul.f32 %v3089_v21, %v1930_v42 }
 0x851   :  { %1932 = vadd.xlane.f32.xlu1 %v1931_v31 }
 0x862   :  { %812 = vperm.xlu1 %2614, %v806_v49  }
 0x866   :  { %1000 = vperm.xlu1 %2614, %v994_v23  }
 0x86a   :  { %1188 = vperm.xlu1 %2614, %v1182_v30  }
 0x86e   :  { %1376 = vperm.xlu1 %2614, %v1370_v36  }
 0x872   :  { %1564 = vperm.xlu1 %2614, %v1558_v43  }
 0x876   :  { %1752 = vperm.xlu1 %2614, %v1746_v51  }
 0x8de   :  { %v1933_v21 = vpop.xlane.xlu1 %1932 }
 0x8df   :  { %v1934_v55 = vadd.f32 %v1993_v5, %v1933_v21 }
 0x8e1   :  { %1940 = vperm.xlu1 %2614, %v1934_v55  }
 0x8e2   :  { %v813_v59 = vpop.permute.xlu1 %812 }
 0x8e3   :  { %v815_v29 = vmul.f32 %v1998_v12, %v813_v59 }
 0x8e5   :  { %v816_v53 = vadd.f32 %v815_v29, %v627_v44 }
 0x8e6   :  { %v1001_v62 = vpop.permute.xlu1 %1000 }
 0x8e7   :  { %v1003_v47 = vmul.f32 %v2002_v25, %v1001_v62 }
 0x8e9   :  { %v1004_v2 = vadd.f32 %v1003_v47, %v816_v53 }
 0x8ea   :  { %v1189_v3 = vpop.permute.xlu1 %1188 }
 0x8eb   :  { %v1191_v57 = vmul.f32 %v2006_v34, %v1189_v3 }
 0x8ed   :  { %v1192_v50 = vadd.f32 %v1191_v57, %v1004_v2 }
 0x8ee   :  { %v1377_v9 = vpop.permute.xlu1 %1376 }
 0x8ef   :  { %v1379_v5 = vmul.f32 %v2010_v8, %v1377_v9 }
 0x8f1   :  { %v1380_v54 = vadd.f32 %v1379_v5, %v1192_v50 }
 0x8f2   :  { %v1565_v40 = vpop.permute.xlu1 %1564 }
 0x8f3   :  { %v1567_v52 = vmul.f32 %v2014_v61, %v1565_v40 }
 0x8f5   :  { %v1568_v60 = vadd.f32 %v1567_v52, %v1380_v54 }
 0x8f6   :  { %v1753_v41 = vpop.permute.xlu1 %1752 }
 0x8f7   :  { %v1755_v56 = vmul.f32 %v2018_v7, %v1753_v41 }
 0x8f9   :  { %v1756_v0 = vadd.f32 %v1755_v56, %v1568_v60 }
 0x960   :  { %v1941_v63 = vpop.permute.xlu1 %1940 }
 0x961   :  { %v1943_v4 = vmul.f32 %v2022_v58, %v1941_v63 }
 0x963   :  { %v1944_v10 = vadd.f32 %v1943_v4, %v1756_v0 }
 0x965   :  { %v1946_v18 = vsel %vm1945_vm9, %v1944_v10, -inf }
 0x966   :  { %1947 = vmax.xlane.f32.xlu1 %v1946_v18 }
 0x9f3   :  { %v1948_v11 = vpop.xlane.xlu1 %1947 }
 0x9f4   :  { %v1949_v22 = vsub.f32 %v1944_v10, %v1948_v11 }
 0x9f6   :  { %v1950_v14 = vmul.f32 1.442695, %v1949_v22 }
 0x9f8   :  { %2743 = vpow2.f32 %v1950_v14 }
 0xa02   :  { %v2744_v19 = vpop.eup %2743 }
 0xa03   :  { %v1952_v15 = vsel %vm1945_vm9, %v2744_v19, 0.0 }
 0xa04   :  { %1953 = vadd.xlane.f32.xlu0 %v1952_v15 }
 0xa91   :  { %v1954_v27 = vpop.xlane.xlu0 %1953 }
 0xa92   :  { %2745 = vrcp.f32 %v1954_v27 }
 0xa9c   :  { %v2746_v1 = vpop.eup %2745 }
 0xa9d   :  { %v1956_v17 = vmul.f32 %v2746_v1, %v2744_v19 }
 0xa9f   :  { %1957 = vst.msk [vmem:[#allocation7] sm:$0xff] %vm1945_vm9, %v1956_v17 }
 0xaa0   :  { %2780 = shalt.err (!%p2777_p12)
}
 0xaa1   :  { %s2781_s22 = scalar_lea.hbm %s3380_s6, 128 }
 0xaa2   :  { %p2782_p13 = scmp.ne.s32.totalorder %s3380_s6, %s2781_s22  ;;  %p2785_p0 = scmp.lt.u32.totalorder %s2781_s22, %s3380_s6 }
 0xaa4   :  { %p2787_p1 = pnand %p2785_p0, %p2782_p13 }
 0xaa6   :  { %2790 = shalt.err (!%p2787_p1)
}
 0xaa7   :  { %1967 = dma.vmem_to_hbm [thread:$0]  %s1965_s18, 128, %s3380_s6, [#allocation6]  }
 0xaa8   :  { %2793 = dma.done.wait [#allocation6], 128  }
 0xaa9   :  { %2794 = vsyncadd [#allocation6], 4294967168 }
 0xaaa   :  { %1971 = vsyncpa [#allocation5], 1 }
 0xaab   :  { %1972 = vsyncpa [#allocation6], 1 }

</bundles_post_ra>
